<compile_context>
chip_gen: v5e
topology: v5e:2x2
jax: 0.10.0
libtpu: 0.0.40
codegen_flags: <defaults>
</compile_context>

<pallas_src>
import functools

import jax
import jax.numpy as jnp
from jax.experimental import pallas as pl
from jax.experimental.pallas import tpu as pltpu

BN_EPS = 1e-5
LANE = 128                           # pad Cout up to the TPU lane width
M_TILE_MAX = 1024                    # rows per M tile (re-derive for real ResNet widths / v7x)
VMEM_LIMIT_BYTES = 32 * 1024 * 1024  # explicit; within every generation's budget


def _round_up(x, d):
    return (x + d - 1) // d * d


# ----------------------------------------------------------------------------
# Kernel A: conv tile (single MXU contraction over K*Cin, bf16 operands,
# f32 accumulation) + per-tile partial BatchNorm statistics.
# Writes the bf16 conv result (no recompute later) and an (8, Cout_pad) block
# whose sublane 0 = sum, sublane 1 = sumsq (rest zero, keeps the store
# fully (8,128)-aligned / unmasked).
# ----------------------------------------------------------------------------
def _conv_stats_kernel(patches_ref, w_ref, conv_ref, stats_ref):
    acc = jnp.dot(patches_ref[...], w_ref[...],
                  preferred_element_type=jnp.float32)
    conv_ref[...] = acc.astype(conv_ref.dtype)
    s = jnp.sum(acc, axis=0, keepdims=True)             # (1, Cout_pad)
    sq = jnp.sum(acc * acc, axis=0, keepdims=True)       # (1, Cout_pad)
    pad = jnp.zeros((6, acc.shape[1]), jnp.float32)
    stats_ref[...] = jnp.concatenate([s, sq, pad], axis=0)[None]   # (1,8,C)


# ----------------------------------------------------------------------------
# Kernel B: fused BN affine (y = x*scale + shift) + ReLU
#           (+ residual add + final ReLU).  f32 math, bf16 in/out.
# ----------------------------------------------------------------------------
def _bn_apply_kernel(apply_relu, has_residual,
                     conv_ref, scale_ref, shift_ref, *rest):
    if has_residual:
        res_ref, out_ref = rest
    else:
        (out_ref,) = rest
    y = conv_ref[...].astype(jnp.float32) * scale_ref[...] + shift_ref[...]
    if apply_relu:
        y = jnp.maximum(y, 0.0)
    if has_residual:
        y = jnp.maximum(y + res_ref[...].astype(jnp.float32), 0.0)
    out_ref[...] = y.astype(out_ref.dtype)


def conv_bn_act(patches, w, gamma, beta, *, relu, residual=None):
    """patches: [M, K*Cin], w: [K*Cin, Cout].

    Returns the lane-padded bf16 result [M, Cout_pad]; callers slice channels.
    The conv bias is intentionally omitted: a per-channel bias is exactly
    removed by training-mode BatchNorm mean subtraction (dead work).
    """
    m, kc = patches.shape
    cout = w.shape[-1]
    cout_pad = _round_up(cout, LANE)

    m_tile = min(M_TILE_MAX, _round_up(m, 8))
    m_pad = _round_up(m, m_tile)
    num_tiles = m_pad // m_tile

    patches_p = patches.astype(jnp.bfloat16)
    if m_pad != m:
        # Zero-padded rows contribute 0 to sum/sumsq, so stats stay exact
        # (we divide by the true M below); padded output rows are sliced off.
        patches_p = jnp.pad(patches_p, ((0, m_pad - m), (0, 0)))
    w_p = jnp.zeros((kc, cout_pad), jnp.bfloat16).at[:, :cout].set(
        w.astype(jnp.bfloat16))

    # ---- kernel A: conv + per-tile partial BN statistics -------------------
    # TODO(synk): build the 9 conv taps in-kernel from a halo'd NHWC tile
    # (memory_space=pl.ANY + manual DMA) to avoid materializing the 9x im2col
    # expansion in HBM.
    # TODO(synk): for real ResNet channel counts on v6e/v7x add a K grid axis
    # (K tile 256-512 over 9*Cin) and 256-wide N tiles; re-derive tile sizes
    # for v7x's 64 MiB VMEM.
    conv_out, stats = pl.pallas_call(
        _conv_stats_kernel,
        out_shape=(jax.ShapeDtypeStruct((m_pad, cout_pad), jnp.bfloat16),
                   jax.ShapeDtypeStruct((num_tiles, 8, cout_pad), jnp.float32)),
        grid_spec=pltpu.PrefetchScalarGridSpec(
            num_scalar_prefetch=0,
            grid=(num_tiles,),
            in_specs=[pl.BlockSpec((m_tile, kc), lambda t: (t, 0)),
                      pl.BlockSpec((kc, cout_pad), lambda t: (0, 0))],
            out_specs=(pl.BlockSpec((m_tile, cout_pad), lambda t: (t, 0)),
                       pl.BlockSpec((1, 8, cout_pad), lambda t: (t, 0, 0))),
        ),
        compiler_params=pltpu.CompilerParams(
            dimension_semantics=("parallel",),      # megacore-parallel on v7x
            vmem_limit_bytes=VMEM_LIMIT_BYTES),
    )(patches_p, w_p)

    # ---- tiny JAX reduction: finalize batch stats -> fused BN affine -------
    # Note: E[x^2]-E[x]^2 in f32 (clamped >= 0); adequate at these magnitudes.
    totals = jnp.sum(stats, axis=0)                  # (8, Cout_pad)
    mean = totals[0] / m
    var = jnp.maximum(totals[1] / m - mean * mean, 0.0)
    g_p = jnp.zeros((cout_pad,), jnp.float32).at[:cout].set(
        gamma.astype(jnp.float32))
    b_p = jnp.zeros((cout_pad,), jnp.float32).at[:cout].set(
        beta.astype(jnp.float32))
    scale = (g_p * jax.lax.rsqrt(var + BN_EPS)).reshape(1, cout_pad)
    shift = (b_p - mean * scale[0]).reshape(1, cout_pad)

    # ---- kernel B: BN affine + ReLU (+ residual add + ReLU) ----------------
    inputs = [conv_out, scale, shift]
    in_specs = [
        # TODO(synk): sweep pipeline_mode=pl.Buffered(3) here if xprof still
        # shows exposed DMA with the larger tiles.
        pl.BlockSpec((m_tile, cout_pad), lambda t: (t, 0)),
        pl.BlockSpec((1, cout_pad), lambda t: (0, 0)),
        pl.BlockSpec((1, cout_pad), lambda t: (0, 0)),
    ]
    if residual is not None:
        res_p = residual.astype(jnp.bfloat16)
        if m_pad != m:
            res_p = jnp.pad(res_p, ((0, m_pad - m), (0, 0)))
        inputs.append(res_p)
        in_specs.append(pl.BlockSpec((m_tile, cout_pad), lambda t: (t, 0)))

    out = pl.pallas_call(
        functools.partial(_bn_apply_kernel, relu, residual is not None),
        out_shape=jax.ShapeDtypeStruct((m_pad, cout_pad), jnp.bfloat16),
        grid_spec=pltpu.PrefetchScalarGridSpec(
            num_scalar_prefetch=0,
            grid=(num_tiles,),
            in_specs=in_specs,
            out_specs=pl.BlockSpec((m_tile, cout_pad), lambda t: (t, 0)),
        ),
        compiler_params=pltpu.CompilerParams(
            dimension_semantics=("parallel",),
            vmem_limit_bytes=VMEM_LIMIT_BYTES),
    )(*inputs)
    return out[:m]                                   # lane-padded bf16 result


# ----------------------------------------------------------------------------
# JAX glue: im2col patch extraction (indexing/layout only, no arithmetic).
# ----------------------------------------------------------------------------
def extract_patches(x_nhwc, ksize, stride, padding):
    n, h, w, c = x_nhwc.shape
    ho = (h + 2 * padding - ksize) // stride + 1
    wo = (w + 2 * padding - ksize) // stride + 1
    xp = jnp.pad(x_nhwc, ((0, 0), (padding, padding), (padding, padding), (0, 0)))
    pats = []
    for kh in range(ksize):
        for kw in range(ksize):
            sl = xp[:, kh:kh + stride * (ho - 1) + 1:stride,
                       kw:kw + stride * (wo - 1) + 1:stride, :]
            pats.append(sl.reshape(n * ho * wo, c))
    # Column order (k major, cin minor) matches w.reshape(K*Cin, Cout).
    return jnp.concatenate(pats, axis=-1), (n, ho, wo)


# ----------------------------------------------------------------------------
# ResBlock forward (NCHW in / NCHW out) built from the fused Pallas kernels.
# ----------------------------------------------------------------------------
def resblock_pallas(x_nchw, params, downsample):
    # NCHW -> NHWC and a single bf16 cast at the top so all patch/residual
    # traffic downstream is half-width.
    x = jnp.transpose(x_nchw, (0, 2, 3, 1)).astype(jnp.bfloat16)
    n, h, w, cin = x.shape
    cout = params["w1"].shape[-1]
    cout_pad = _round_up(cout, LANE)
    s = 2 if downsample else 1

    # conv1 + bn1 + relu
    p1, (_, ho, wo) = extract_patches(x, 3, s, 1)
    y1 = conv_bn_act(p1, params["w1"].reshape(9 * cin, cout),
                     params["g1"], params["be1"], relu=True)   # (M1, Cout_pad) bf16
    y1_img = y1[:, :cout].reshape(n, ho, wo, cout)

    # shortcut branch (kept lane-padded bf16; only fetched by the apply kernel)
    if downsample:
        ps, _ = extract_patches(x, 1, 2, 0)
        sc = conv_bn_act(ps, params["ws"].reshape(cin, cout),
                         params["gs"], params["bes"], relu=False)
    else:
        assert cin == cout, "identity shortcut requires cin == cout"
        sc = jnp.zeros((n * h * w, cout_pad), jnp.bfloat16).at[:, :cout].set(
            x.reshape(n * h * w, cin))

    # conv2 + bn2 + relu, then fused residual add + final relu
    p2, _ = extract_patches(y1_img, 3, 1, 1)
    out = conv_bn_act(p2, params["w2"].reshape(9 * cout, cout),
                      params["g2"], params["be2"], relu=True, residual=sc)
    out = out[:, :cout].astype(jnp.float32).reshape(n, ho, wo, cout)
    return jnp.transpose(out, (0, 3, 1, 2))


# ----------------------------------------------------------------------------
# Pure-JAX reference (matches the PyTorch module in training mode, incl. bias).
# ----------------------------------------------------------------------------
def resblock_ref(x_nchw, params, downsample):
    x = jnp.transpose(x_nchw, (0, 2, 3, 1))

    def conv(x_, w_, b_, stride, pad):
        y = jax.lax.conv_general_dilated(
            x_, w_, (stride, stride), [(pad, pad), (pad, pad)],
            dimension_numbers=("NHWC", "HWIO", "NHWC"),
            precision=jax.lax.Precision.HIGHEST)
        return y + b_

    def bn(y, g, be):
        m = jnp.mean(y, axis=(0, 1, 2), keepdims=True)
        v = jnp.mean((y - m) ** 2, axis=(0, 1, 2), keepdims=True)
        return (y - m) * jax.lax.rsqrt(v + BN_EPS) * g + be

    s = 2 if downsample else 1
    if downsample:
        sc = bn(conv(x, params["ws"], params["bs"], 2, 0), params["gs"], params["bes"])
    else:
        sc = x
    h = jax.nn.relu(bn(conv(x, params["w1"], params["b1"], s, 1),
                       params["g1"], params["be1"]))
    h = jax.nn.relu(bn(conv(h, params["w2"], params["b2"], 1, 1),
                       params["g2"], params["be2"]))
    out = jax.nn.relu(h + sc)
    return jnp.transpose(out, (0, 3, 1, 2))


def init_params(key, cin, cout, downsample):
    ks = jax.random.split(key, 12)
    p = {
        "w1": 0.1 * jax.random.normal(ks[0], (3, 3, cin, cout), jnp.float32),
        "b1": 0.1 * jax.random.normal(ks[1], (cout,), jnp.float32),
        "g1": 1.0 + 0.1 * jax.random.normal(ks[2], (cout,), jnp.float32),
        "be1": 0.1 * jax.random.normal(ks[3], (cout,), jnp.float32),
        "w2": 0.1 * jax.random.normal(ks[4], (3, 3, cout, cout), jnp.float32),
        "b2": 0.1 * jax.random.normal(ks[5], (cout,), jnp.float32),
        "g2": 1.0 + 0.1 * jax.random.normal(ks[6], (cout,), jnp.float32),
        "be2": 0.1 * jax.random.normal(ks[7], (cout,), jnp.float32),
    }
    if downsample:
        p.update({
            "ws": 0.1 * jax.random.normal(ks[8], (1, 1, cin, cout), jnp.float32),
            "bs": 0.1 * jax.random.normal(ks[9], (cout,), jnp.float32),
            "gs": 1.0 + 0.1 * jax.random.normal(ks[10], (cout,), jnp.float32),
            "bes": 0.1 * jax.random.normal(ks[11], (cout,), jnp.float32),
        })
    return p


if __name__ == "__main__":
    key = jax.random.PRNGKey(0)
    kx1, kp1, kx2, kp2 = jax.random.split(key, 4)

    fwd = jax.jit(resblock_pallas, static_argnames=("downsample",))

    # Config A: downsample ResBlock, in=4 -> out=8 channels, 16x16 -> 8x8.
    x_a = jax.random.normal(kx1, (2, 4, 16, 16), jnp.float32)  # NCHW
    params_a = init_params(kp1, 4, 8, downsample=True)
    out_a = jax.block_until_ready(fwd(x_a, params_a, downsample=True))
    ref_a = resblock_ref(x_a, params_a, downsample=True)
    assert out_a.shape == (2, 8, 8, 8)
    # bf16 matmul operands / bf16 intermediates (f32 accumulate & BN math)
    # -> slightly looser tolerance than pure f32.
    assert jnp.allclose(out_a, ref_a, rtol=5e-2, atol=5e-2), "downsample=True mismatch"

    # Config B: non-downsample ResBlock, identity shortcut (in == out == 8).
    x_b = jax.random.normal(kx2, (2, 8, 16, 16), jnp.float32)  # NCHW
    params_b = init_params(kp2, 8, 8, downsample=False)
    out_b = jax.block_until_ready(fwd(x_b, params_b, downsample=False))
    ref_b = resblock_ref(x_b, params_b, downsample=False)
    assert out_b.shape == (2, 8, 16, 16)
    assert jnp.allclose(out_b, ref_b, rtol=5e-2, atol=5e-2), "downsample=False mismatch"

    print("KERNEL_OK")
</pallas_src>

<mosaic_0001>
module attributes {stable_mosaic.version = 11 : i64} {
  func.func @_conv_stats_kernel(%arg0: i32, %arg1: memref<128x36xbf16, #tpu.memory_space<vmem>>, %arg2: memref<36x128xbf16, #tpu.memory_space<vmem>>, %arg3: memref<128x128xbf16, #tpu.memory_space<vmem>>, %arg4: memref<1x8x128xf32, #tpu.memory_space<vmem>>) attributes {dimension_semantics = [#tpu.dimension_semantics<parallel>], iteration_bounds = array<i64: 1>, scalar_prefetch = 0 : i64, scratch_operands = 0 : i64, tpu.core_type = #tpu.core_type<tc>, window_params = [{transform_indices = @transform_0, window_bounds = array<i64: 128, 36>}, {pipeline_mode = #tpu.pipeline_mode<synchronous>, transform_indices = @transform_1, window_bounds = array<i64: 36, 128>}, {transform_indices = @transform_2, window_bounds = array<i64: 128, 128>}, {transform_indices = @transform_3, window_bounds = array<i64: 1, 8, 128>}]} {
    %c0 = arith.constant 0 : index
    %c0_0 = arith.constant 0 : index
    %0 = vector.load %arg1[%c0, %c0_0] : memref<128x36xbf16, #tpu.memory_space<vmem>>, vector<128x36xbf16>
    %c0_1 = arith.constant 0 : index
    %c0_2 = arith.constant 0 : index
    %1 = vector.load %arg2[%c0_1, %c0_2] : memref<36x128xbf16, #tpu.memory_space<vmem>>, vector<36x128xbf16>
    %cst = arith.constant dense<0.000000e+00> : vector<128x128xf32>
    %2 = tpu.matmul %0, %1, %cst {dimension_numbers = #tpu.dot_dimension_numbers<[1], [0], [0], [1], [0, 0, 1, 1], [], []>} : vector<128x36xbf16>, vector<36x128xbf16>, vector<128x128xf32> -> vector<128x128xf32>
    %3 = arith.truncf %2 : vector<128x128xf32> to vector<128x128xbf16>
    %c0_3 = arith.constant 0 : index
    %c0_4 = arith.constant 0 : index
    %4 = vector.load %arg3[%c0_3, %c0_4] : memref<128x128xbf16, #tpu.memory_space<vmem>>, vector<128x128xbf16>
    tpu.vector_store %arg3[%c0_3, %c0_4], %3 {strides = array<i32>} : memref<128x128xbf16, #tpu.memory_space<vmem>>, vector<128x128xbf16>,
    %cst_5 = arith.constant dense<0.000000e+00> : vector<128xf32>
    %5 = vector.multi_reduction <add>, %2, %cst_5 [0] : vector<128x128xf32> to vector<128xf32>
    %6 = vector.shape_cast %5 : vector<128xf32> to vector<1x128xf32>
    %7 = arith.mulf %2, %2 : vector<128x128xf32>
    %cst_6 = arith.constant dense<0.000000e+00> : vector<128xf32>
    %8 = vector.multi_reduction <add>, %7, %cst_6 [0] : vector<128x128xf32> to vector<128xf32>
    %9 = vector.shape_cast %8 : vector<128xf32> to vector<1x128xf32>
    %cst_7 = arith.constant 0.000000e+00 : f32
    %10 = vector.broadcast %cst_7 : f32 to vector<6x128xf32>
    %11 = tpu.concatenate %6, %9, %10 in 0 : vector<1x128xf32>, vector<1x128xf32>, vector<6x128xf32> -> vector<8x128xf32>
    %12 = vector.shape_cast %11 : vector<8x128xf32> to vector<1x8x128xf32>
    %c0_8 = arith.constant 0 : index
    %c0_9 = arith.constant 0 : index
    %c0_10 = arith.constant 0 : index
    %13 = vector.load %arg4[%c0_8, %c0_9, %c0_10] : memref<1x8x128xf32, #tpu.memory_space<vmem>>, vector<1x8x128xf32>
    tpu.vector_store %arg4[%c0_8, %c0_9, %c0_10], %12 {strides = array<i32>} : memref<1x8x128xf32, #tpu.memory_space<vmem>>, vector<1x8x128xf32>,
    return
  }
  func.func @transform_0(%arg0: i32) -> (i32, i32) {
    %c0_i32 = arith.constant 0 : i32
    %c0_i32_0 = arith.constant 0 : i32
    return %arg0, %c0_i32 : i32, i32
  }
  func.func @transform_1(%arg0: i32) -> (i32, i32) {
    %c0_i32 = arith.constant 0 : i32
    %c0_i32_0 = arith.constant 0 : i32
    %c0_i32_1 = arith.constant 0 : i32
    return %c0_i32, %c0_i32_0 : i32, i32
  }
  func.func @transform_2(%arg0: i32) -> (i32, i32) {
    %c0_i32 = arith.constant 0 : i32
    %c0_i32_0 = arith.constant 0 : i32
    return %arg0, %c0_i32 : i32, i32
  }
  func.func @transform_3(%arg0: i32) -> (i32, i32, i32) {
    %c0_i32 = arith.constant 0 : i32
    %c0_i32_0 = arith.constant 0 : i32
    %c0_i32_1 = arith.constant 0 : i32
    return %arg0, %c0_i32, %c0_i32_0 : i32, i32, i32
  }
}

module attributes {stable_mosaic.version = 11 : i64} {
  func.func @_bn_apply_kernel(%arg0: i32, %arg1: memref<128x128xbf16, #tpu.memory_space<vmem>>, %arg2: memref<1x128xf32, #tpu.memory_space<vmem>>, %arg3: memref<1x128xf32, #tpu.memory_space<vmem>>, %arg4: memref<128x128xbf16, #tpu.memory_space<vmem>>) attributes {dimension_semantics = [#tpu.dimension_semantics<parallel>], iteration_bounds = array<i64: 1>, scalar_prefetch = 0 : i64, scratch_operands = 0 : i64, tpu.core_type = #tpu.core_type<tc>, window_params = [{transform_indices = @transform_0, window_bounds = array<i64: 128, 128>}, {pipeline_mode = #tpu.pipeline_mode<synchronous>, transform_indices = @transform_1, window_bounds = array<i64: 1, 128>}, {pipeline_mode = #tpu.pipeline_mode<synchronous>, transform_indices = @transform_2, window_bounds = array<i64: 1, 128>}, {transform_indices = @transform_3, window_bounds = array<i64: 128, 128>}]} {
    %c0 = arith.constant 0 : index
    %c0_0 = arith.constant 0 : index
    %0 = vector.load %arg1[%c0, %c0_0] : memref<128x128xbf16, #tpu.memory_space<vmem>>, vector<128x128xbf16>
    %1 = arith.extf %0 : vector<128x128xbf16> to vector<128x128xf32>
    %c0_1 = arith.constant 0 : index
    %c0_2 = arith.constant 0 : index
    %2 = vector.load %arg2[%c0_1, %c0_2] : memref<1x128xf32, #tpu.memory_space<vmem>>, vector<1x128xf32>
    %3 = vector.broadcast %2 : vector<1x128xf32> to vector<128x128xf32>
    %4 = arith.mulf %1, %3 : vector<128x128xf32>
    %c0_3 = arith.constant 0 : index
    %c0_4 = arith.constant 0 : index
    %5 = vector.load %arg3[%c0_3, %c0_4] : memref<1x128xf32, #tpu.memory_space<vmem>>, vector<1x128xf32>
    %6 = vector.broadcast %5 : vector<1x128xf32> to vector<128x128xf32>
    %7 = arith.addf %4, %6 : vector<128x128xf32>
    %cst = arith.constant 0.000000e+00 : f32
    %8 = vector.broadcast %cst : f32 to vector<128x128xf32>
    %9 = arith.maximumf %7, %8 : vector<128x128xf32>
    %10 = arith.truncf %9 : vector<128x128xf32> to vector<128x128xbf16>
    %c0_5 = arith.constant 0 : index
    %c0_6 = arith.constant 0 : index
    %11 = vector.load %arg4[%c0_5, %c0_6] : memref<128x128xbf16, #tpu.memory_space<vmem>>, vector<128x128xbf16>
    tpu.vector_store %arg4[%c0_5, %c0_6], %10 {strides = array<i32>} : memref<128x128xbf16, #tpu.memory_space<vmem>>, vector<128x128xbf16>,
    return
  }
  func.func @transform_0(%arg0: i32) -> (i32, i32) {
    %c0_i32 = arith.constant 0 : i32
    %c0_i32_0 = arith.constant 0 : i32
    return %arg0, %c0_i32 : i32, i32
  }
  func.func @transform_1(%arg0: i32) -> (i32, i32) {
    %c0_i32 = arith.constant 0 : i32
    %c0_i32_0 = arith.constant 0 : i32
    %c0_i32_1 = arith.constant 0 : i32
    return %c0_i32, %c0_i32_0 : i32, i32
  }
  func.func @transform_2(%arg0: i32) -> (i32, i32) {
    %c0_i32 = arith.constant 0 : i32
    %c0_i32_0 = arith.constant 0 : i32
    %c0_i32_1 = arith.constant 0 : i32
    return %c0_i32, %c0_i32_0 : i32, i32
  }
  func.func @transform_3(%arg0: i32) -> (i32, i32) {
    %c0_i32 = arith.constant 0 : i32
    %c0_i32_0 = arith.constant 0 : i32
    return %arg0, %c0_i32 : i32, i32
  }
}

module attributes {stable_mosaic.version = 11 : i64} {
  func.func @_conv_stats_kernel(%arg0: i32, %arg1: memref<128x72xbf16, #tpu.memory_space<vmem>>, %arg2: memref<72x128xbf16, #tpu.memory_space<vmem>>, %arg3: memref<128x128xbf16, #tpu.memory_space<vmem>>, %arg4: memref<1x8x128xf32, #tpu.memory_space<vmem>>) attributes {dimension_semantics = [#tpu.dimension_semantics<parallel>], iteration_bounds = array<i64: 1>, scalar_prefetch = 0 : i64, scratch_operands = 0 : i64, tpu.core_type = #tpu.core_type<tc>, window_params = [{transform_indices = @transform_0, window_bounds = array<i64: 128, 72>}, {pipeline_mode = #tpu.pipeline_mode<synchronous>, transform_indices = @transform_1, window_bounds = array<i64: 72, 128>}, {transform_indices = @transform_2, window_bounds = array<i64: 128, 128>}, {transform_indices = @transform_3, window_bounds = array<i64: 1, 8, 128>}]} {
    %c0 = arith.constant 0 : index
    %c0_0 = arith.constant 0 : index
    %0 = vector.load %arg1[%c0, %c0_0] : memref<128x72xbf16, #tpu.memory_space<vmem>>, vector<128x72xbf16>
    %c0_1 = arith.constant 0 : index
    %c0_2 = arith.constant 0 : index
    %1 = vector.load %arg2[%c0_1, %c0_2] : memref<72x128xbf16, #tpu.memory_space<vmem>>, vector<72x128xbf16>
    %cst = arith.constant dense<0.000000e+00> : vector<128x128xf32>
    %2 = tpu.matmul %0, %1, %cst {dimension_numbers = #tpu.dot_dimension_numbers<[1], [0], [0], [1], [0, 0, 1, 1], [], []>} : vector<128x72xbf16>, vector<72x128xbf16>, vector<128x128xf32> -> vector<128x128xf32>
    %3 = arith.truncf %2 : vector<128x128xf32> to vector<128x128xbf16>
    %c0_3 = arith.constant 0 : index
    %c0_4 = arith.constant 0 : index
    %4 = vector.load %arg3[%c0_3, %c0_4] : memref<128x128xbf16, #tpu.memory_space<vmem>>, vector<128x128xbf16>
    tpu.vector_store %arg3[%c0_3, %c0_4], %3 {strides = array<i32>} : memref<128x128xbf16, #tpu.memory_space<vmem>>, vector<128x128xbf16>,
    %cst_5 = arith.constant dense<0.000000e+00> : vector<128xf32>
    %5 = vector.multi_reduction <add>, %2, %cst_5 [0] : vector<128x128xf32> to vector<128xf32>
    %6 = vector.shape_cast %5 : vector<128xf32> to vector<1x128xf32>
    %7 = arith.mulf %2, %2 : vector<128x128xf32>
    %cst_6 = arith.constant dense<0.000000e+00> : vector<128xf32>
    %8 = vector.multi_reduction <add>, %7, %cst_6 [0] : vector<128x128xf32> to vector<128xf32>
    %9 = vector.shape_cast %8 : vector<128xf32> to vector<1x128xf32>
    %cst_7 = arith.constant 0.000000e+00 : f32
    %10 = vector.broadcast %cst_7 : f32 to vector<6x128xf32>
    %11 = tpu.concatenate %6, %9, %10 in 0 : vector<1x128xf32>, vector<1x128xf32>, vector<6x128xf32> -> vector<8x128xf32>
    %12 = vector.shape_cast %11 : vector<8x128xf32> to vector<1x8x128xf32>
    %c0_8 = arith.constant 0 : index
    %c0_9 = arith.constant 0 : index
    %c0_10 = arith.constant 0 : index
    %13 = vector.load %arg4[%c0_8, %c0_9, %c0_10] : memref<1x8x128xf32, #tpu.memory_space<vmem>>, vector<1x8x128xf32>
    tpu.vector_store %arg4[%c0_8, %c0_9, %c0_10], %12 {strides = array<i32>} : memref<1x8x128xf32, #tpu.memory_space<vmem>>, vector<1x8x128xf32>,
    return
  }
  func.func @transform_0(%arg0: i32) -> (i32, i32) {
    %c0_i32 = arith.constant 0 : i32
    %c0_i32_0 = arith.constant 0 : i32
    return %arg0, %c0_i32 : i32, i32
  }
  func.func @transform_1(%arg0: i32) -> (i32, i32) {
    %c0_i32 = arith.constant 0 : i32
    %c0_i32_0 = arith.constant 0 : i32
    %c0_i32_1 = arith.constant 0 : i32
    return %c0_i32, %c0_i32_0 : i32, i32
  }
  func.func @transform_2(%arg0: i32) -> (i32, i32) {
    %c0_i32 = arith.constant 0 : i32
    %c0_i32_0 = arith.constant 0 : i32
    return %arg0, %c0_i32 : i32, i32
  }
  func.func @transform_3(%arg0: i32) -> (i32, i32, i32) {
    %c0_i32 = arith.constant 0 : i32
    %c0_i32_0 = arith.constant 0 : i32
    %c0_i32_1 = arith.constant 0 : i32
    return %arg0, %c0_i32, %c0_i32_0 : i32, i32, i32
  }
}

module attributes {stable_mosaic.version = 11 : i64} {
  func.func @_conv_stats_kernel(%arg0: i32, %arg1: memref<128x4xbf16, #tpu.memory_space<vmem>>, %arg2: memref<4x128xbf16, #tpu.memory_space<vmem>>, %arg3: memref<128x128xbf16, #tpu.memory_space<vmem>>, %arg4: memref<1x8x128xf32, #tpu.memory_space<vmem>>) attributes {dimension_semantics = [#tpu.dimension_semantics<parallel>], iteration_bounds = array<i64: 1>, scalar_prefetch = 0 : i64, scratch_operands = 0 : i64, tpu.core_type = #tpu.core_type<tc>, window_params = [{transform_indices = @transform_0, window_bounds = array<i64: 128, 4>}, {pipeline_mode = #tpu.pipeline_mode<synchronous>, transform_indices = @transform_1, window_bounds = array<i64: 4, 128>}, {transform_indices = @transform_2, window_bounds = array<i64: 128, 128>}, {transform_indices = @transform_3, window_bounds = array<i64: 1, 8, 128>}]} {
    %c0 = arith.constant 0 : index
    %c0_0 = arith.constant 0 : index
    %0 = vector.load %arg1[%c0, %c0_0] : memref<128x4xbf16, #tpu.memory_space<vmem>>, vector<128x4xbf16>
    %c0_1 = arith.constant 0 : index
    %c0_2 = arith.constant 0 : index
    %1 = vector.load %arg2[%c0_1, %c0_2] : memref<4x128xbf16, #tpu.memory_space<vmem>>, vector<4x128xbf16>
    %cst = arith.constant dense<0.000000e+00> : vector<128x128xf32>
    %2 = tpu.matmul %0, %1, %cst {dimension_numbers = #tpu.dot_dimension_numbers<[1], [0], [0], [1], [0, 0, 1, 1], [], []>} : vector<128x4xbf16>, vector<4x128xbf16>, vector<128x128xf32> -> vector<128x128xf32>
    %3 = arith.truncf %2 : vector<128x128xf32> to vector<128x128xbf16>
    %c0_3 = arith.constant 0 : index
    %c0_4 = arith.constant 0 : index
    %4 = vector.load %arg3[%c0_3, %c0_4] : memref<128x128xbf16, #tpu.memory_space<vmem>>, vector<128x128xbf16>
    tpu.vector_store %arg3[%c0_3, %c0_4], %3 {strides = array<i32>} : memref<128x128xbf16, #tpu.memory_space<vmem>>, vector<128x128xbf16>,
    %cst_5 = arith.constant dense<0.000000e+00> : vector<128xf32>
    %5 = vector.multi_reduction <add>, %2, %cst_5 [0] : vector<128x128xf32> to vector<128xf32>
    %6 = vector.shape_cast %5 : vector<128xf32> to vector<1x128xf32>
    %7 = arith.mulf %2, %2 : vector<128x128xf32>
    %cst_6 = arith.constant dense<0.000000e+00> : vector<128xf32>
    %8 = vector.multi_reduction <add>, %7, %cst_6 [0] : vector<128x128xf32> to vector<128xf32>
    %9 = vector.shape_cast %8 : vector<128xf32> to vector<1x128xf32>
    %cst_7 = arith.constant 0.000000e+00 : f32
    %10 = vector.broadcast %cst_7 : f32 to vector<6x128xf32>
    %11 = tpu.concatenate %6, %9, %10 in 0 : vector<1x128xf32>, vector<1x128xf32>, vector<6x128xf32> -> vector<8x128xf32>
    %12 = vector.shape_cast %11 : vector<8x128xf32> to vector<1x8x128xf32>
    %c0_8 = arith.constant 0 : index
    %c0_9 = arith.constant 0 : index
    %c0_10 = arith.constant 0 : index
    %13 = vector.load %arg4[%c0_8, %c0_9, %c0_10] : memref<1x8x128xf32, #tpu.memory_space<vmem>>, vector<1x8x128xf32>
    tpu.vector_store %arg4[%c0_8, %c0_9, %c0_10], %12 {strides = array<i32>} : memref<1x8x128xf32, #tpu.memory_space<vmem>>, vector<1x8x128xf32>,
    return
  }
  func.func @transform_0(%arg0: i32) -> (i32, i32) {
    %c0_i32 = arith.constant 0 : i32
    %c0_i32_0 = arith.constant 0 : i32
    return %arg0, %c0_i32 : i32, i32
  }
  func.func @transform_1(%arg0: i32) -> (i32, i32) {
    %c0_i32 = arith.constant 0 : i32
    %c0_i32_0 = arith.constant 0 : i32
    %c0_i32_1 = arith.constant 0 : i32
    return %c0_i32, %c0_i32_0 : i32, i32
  }
  func.func @transform_2(%arg0: i32) -> (i32, i32) {
    %c0_i32 = arith.constant 0 : i32
    %c0_i32_0 = arith.constant 0 : i32
    return %arg0, %c0_i32 : i32, i32
  }
  func.func @transform_3(%arg0: i32) -> (i32, i32, i32) {
    %c0_i32 = arith.constant 0 : i32
    %c0_i32_0 = arith.constant 0 : i32
    %c0_i32_1 = arith.constant 0 : i32
    return %arg0, %c0_i32, %c0_i32_0 : i32, i32, i32
  }
}

module attributes {stable_mosaic.version = 11 : i64} {
  func.func @_bn_apply_kernel(%arg0: i32, %arg1: memref<128x128xbf16, #tpu.memory_space<vmem>>, %arg2: memref<1x128xf32, #tpu.memory_space<vmem>>, %arg3: memref<1x128xf32, #tpu.memory_space<vmem>>, %arg4: memref<128x128xbf16, #tpu.memory_space<vmem>>) attributes {dimension_semantics = [#tpu.dimension_semantics<parallel>], iteration_bounds = array<i64: 1>, scalar_prefetch = 0 : i64, scratch_operands = 0 : i64, tpu.core_type = #tpu.core_type<tc>, window_params = [{transform_indices = @transform_0, window_bounds = array<i64: 128, 128>}, {pipeline_mode = #tpu.pipeline_mode<synchronous>, transform_indices = @transform_1, window_bounds = array<i64: 1, 128>}, {pipeline_mode = #tpu.pipeline_mode<synchronous>, transform_indices = @transform_2, window_bounds = array<i64: 1, 128>}, {transform_indices = @transform_3, window_bounds = array<i64: 128, 128>}]} {
    %c0 = arith.constant 0 : index
    %c0_0 = arith.constant 0 : index
    %0 = vector.load %arg1[%c0, %c0_0] : memref<128x128xbf16, #tpu.memory_space<vmem>>, vector<128x128xbf16>
    %1 = arith.extf %0 : vector<128x128xbf16> to vector<128x128xf32>
    %c0_1 = arith.constant 0 : index
    %c0_2 = arith.constant 0 : index
    %2 = vector.load %arg2[%c0_1, %c0_2] : memref<1x128xf32, #tpu.memory_space<vmem>>, vector<1x128xf32>
    %3 = vector.broadcast %2 : vector<1x128xf32> to vector<128x128xf32>
    %4 = arith.mulf %1, %3 : vector<128x128xf32>
    %c0_3 = arith.constant 0 : index
    %c0_4 = arith.constant 0 : index
    %5 = vector.load %arg3[%c0_3, %c0_4] : memref<1x128xf32, #tpu.memory_space<vmem>>, vector<1x128xf32>
    %6 = vector.broadcast %5 : vector<1x128xf32> to vector<128x128xf32>
    %7 = arith.addf %4, %6 : vector<128x128xf32>
    %8 = arith.truncf %7 : vector<128x128xf32> to vector<128x128xbf16>
    %c0_5 = arith.constant 0 : index
    %c0_6 = arith.constant 0 : index
    %9 = vector.load %arg4[%c0_5, %c0_6] : memref<128x128xbf16, #tpu.memory_space<vmem>>, vector<128x128xbf16>
    tpu.vector_store %arg4[%c0_5, %c0_6], %8 {strides = array<i32>} : memref<128x128xbf16, #tpu.memory_space<vmem>>, vector<128x128xbf16>,
    return
  }
  func.func @transform_0(%arg0: i32) -> (i32, i32) {
    %c0_i32 = arith.constant 0 : i32
    %c0_i32_0 = arith.constant 0 : i32
    return %arg0, %c0_i32 : i32, i32
  }
  func.func @transform_1(%arg0: i32) -> (i32, i32) {
    %c0_i32 = arith.constant 0 : i32
    %c0_i32_0 = arith.constant 0 : i32
    %c0_i32_1 = arith.constant 0 : i32
    return %c0_i32, %c0_i32_0 : i32, i32
  }
  func.func @transform_2(%arg0: i32) -> (i32, i32) {
    %c0_i32 = arith.constant 0 : i32
    %c0_i32_0 = arith.constant 0 : i32
    %c0_i32_1 = arith.constant 0 : i32
    return %c0_i32, %c0_i32_0 : i32, i32
  }
  func.func @transform_3(%arg0: i32) -> (i32, i32) {
    %c0_i32 = arith.constant 0 : i32
    %c0_i32_0 = arith.constant 0 : i32
    return %arg0, %c0_i32 : i32, i32
  }
}

module attributes {stable_mosaic.version = 11 : i64} {
  func.func @_bn_apply_kernel(%arg0: i32, %arg1: memref<128x128xbf16, #tpu.memory_space<vmem>>, %arg2: memref<1x128xf32, #tpu.memory_space<vmem>>, %arg3: memref<1x128xf32, #tpu.memory_space<vmem>>, %arg4: memref<128x128xbf16, #tpu.memory_space<vmem>>, %arg5: memref<128x128xbf16, #tpu.memory_space<vmem>>) attributes {dimension_semantics = [#tpu.dimension_semantics<parallel>], iteration_bounds = array<i64: 1>, scalar_prefetch = 0 : i64, scratch_operands = 0 : i64, tpu.core_type = #tpu.core_type<tc>, window_params = [{transform_indices = @transform_0, window_bounds = array<i64: 128, 128>}, {pipeline_mode = #tpu.pipeline_mode<synchronous>, transform_indices = @transform_1, window_bounds = array<i64: 1, 128>}, {pipeline_mode = #tpu.pipeline_mode<synchronous>, transform_indices = @transform_2, window_bounds = array<i64: 1, 128>}, {transform_indices = @transform_3, window_bounds = array<i64: 128, 128>}, {transform_indices = @transform_4, window_bounds = array<i64: 128, 128>}]} {
    %c0 = arith.constant 0 : index
    %c0_0 = arith.constant 0 : index
    %0 = vector.load %arg1[%c0, %c0_0] : memref<128x128xbf16, #tpu.memory_space<vmem>>, vector<128x128xbf16>
    %1 = arith.extf %0 : vector<128x128xbf16> to vector<128x128xf32>
    %c0_1 = arith.constant 0 : index
    %c0_2 = arith.constant 0 : index
    %2 = vector.load %arg2[%c0_1, %c0_2] : memref<1x128xf32, #tpu.memory_space<vmem>>, vector<1x128xf32>
    %3 = vector.broadcast %2 : vector<1x128xf32> to vector<128x128xf32>
    %4 = arith.mulf %1, %3 : vector<128x128xf32>
    %c0_3 = arith.constant 0 : index
    %c0_4 = arith.constant 0 : index
    %5 = vector.load %arg3[%c0_3, %c0_4] : memref<1x128xf32, #tpu.memory_space<vmem>>, vector<1x128xf32>
    %6 = vector.broadcast %5 : vector<1x128xf32> to vector<128x128xf32>
    %7 = arith.addf %4, %6 : vector<128x128xf32>
    %cst = arith.constant 0.000000e+00 : f32
    %8 = vector.broadcast %cst : f32 to vector<128x128xf32>
    %9 = arith.maximumf %7, %8 : vector<128x128xf32>
    %c0_5 = arith.constant 0 : index
    %c0_6 = arith.constant 0 : index
    %10 = vector.load %arg4[%c0_5, %c0_6] : memref<128x128xbf16, #tpu.memory_space<vmem>>, vector<128x128xbf16>
    %11 = arith.extf %10 : vector<128x128xbf16> to vector<128x128xf32>
    %12 = arith.addf %9, %11 : vector<128x128xf32>
    %cst_7 = arith.constant 0.000000e+00 : f32
    %13 = vector.broadcast %cst_7 : f32 to vector<128x128xf32>
    %14 = arith.maximumf %12, %13 : vector<128x128xf32>
    %15 = arith.truncf %14 : vector<128x128xf32> to vector<128x128xbf16>
    %c0_8 = arith.constant 0 : index
    %c0_9 = arith.constant 0 : index
    %16 = vector.load %arg5[%c0_8, %c0_9] : memref<128x128xbf16, #tpu.memory_space<vmem>>, vector<128x128xbf16>
    tpu.vector_store %arg5[%c0_8, %c0_9], %15 {strides = array<i32>} : memref<128x128xbf16, #tpu.memory_space<vmem>>, vector<128x128xbf16>,
    return
  }
  func.func @transform_0(%arg0: i32) -> (i32, i32) {
    %c0_i32 = arith.constant 0 : i32
    %c0_i32_0 = arith.constant 0 : i32
    return %arg0, %c0_i32 : i32, i32
  }
  func.func @transform_1(%arg0: i32) -> (i32, i32) {
    %c0_i32 = arith.constant 0 : i32
    %c0_i32_0 = arith.constant 0 : i32
    %c0_i32_1 = arith.constant 0 : i32
    return %c0_i32, %c0_i32_0 : i32, i32
  }
  func.func @transform_2(%arg0: i32) -> (i32, i32) {
    %c0_i32 = arith.constant 0 : i32
    %c0_i32_0 = arith.constant 0 : i32
    %c0_i32_1 = arith.constant 0 : i32
    return %c0_i32, %c0_i32_0 : i32, i32
  }
  func.func @transform_3(%arg0: i32) -> (i32, i32) {
    %c0_i32 = arith.constant 0 : i32
    %c0_i32_0 = arith.constant 0 : i32
    return %arg0, %c0_i32 : i32, i32
  }
  func.func @transform_4(%arg0: i32) -> (i32, i32) {
    %c0_i32 = arith.constant 0 : i32
    %c0_i32_0 = arith.constant 0 : i32
    return %arg0, %c0_i32 : i32, i32
  }
}

</mosaic_0001>

<bundles_post_ra>
// kernel: resblock_pallas.7
= control target key start
LH: loop header
LB: loop body
LE: loop exit
PB: predicated region body
PF: predicated region fallthrough
CT: control target
= control target key end

     0   :  { %s336_s0 = inlined_call_operand.vmem [shape: bf16[128,128], index: 0, kind: input, shape index: {}]   ;;  %s337_s1 = inlined_call_operand.vmem [shape: f32[1,128], index: 1, kind: input, shape index: {}]   ;;  %s338_s2 = inlined_call_operand.vmem [shape: f32[1,128], index: 2, kind: input, shape index: {}]   ;;  %s339_s3 = inlined_call_operand.vmem [shape: bf16[128,128], index: 3, kind: output, shape index: {}]  }
   0x1   :  { %v139_v0 = vld [vmem:[%s336_s0] sm:$0xff]   ;;  %v210_v5 = vld [vmem:[%s336_s0 + $0x8] sm:$0xff]   ;;  %v211_v8 = vld [vmem:[%s336_s0 + $0x10] sm:$0xff]  }
   0x2   :  { %v252_v1 = vld [vmem:[%s337_s1] ss:$0 sm:$0xff]  ;;  %v140_v2 = vunpack.c.l.bf16 %v139_v0  ;;  %v141_v3 = vunpack.c.h.bf16 %v139_v0  ;;  %v144_v6 = vunpack.c.l.bf16 %v210_v5  ;;  %v145_v7 = vunpack.c.h.bf16 %v210_v5  ;;  %v212_v9 = vld [vmem:[%s336_s0 + $0x18] sm:$0xff]   ;;  %v214_v35 = vld [vmem:[%s336_s0 + $0x28] sm:$0xff]  }
   0x3   :  { %v257_v4 = vld [vmem:[%s338_s2] ss:$0 sm:$0xff]  ;;  %v148_v12 = vunpack.c.l.bf16 %v211_v8  ;;  %v149_v13 = vunpack.c.h.bf16 %v211_v8  ;;  %v152_v16 = vunpack.c.l.bf16 %v212_v9  ;;  %v153_v17 = vunpack.c.h.bf16 %v212_v9  ;;  %v215_v40 = vld [vmem:[%s336_s0 + $0x30] sm:$0xff]   ;;  %v216_v45 = vld [vmem:[%s336_s0 + $0x38] sm:$0xff]  }
   0x4   :  { %v50_v10 = vmul.f32 %v252_v1, %v140_v2  ;;  %v51_v11 = vmul.f32 %v252_v1, %v141_v3  ;;  %v52_v14 = vmul.f32 %v252_v1, %v144_v6  ;;  %v53_v15 = vmul.f32 %v252_v1, %v145_v7  ;;  %v213_v26 = vld [vmem:[%s336_s0 + $0x20] sm:$0xff]  }
   0x5   :  { %v54_v20 = vmul.f32 %v252_v1, %v148_v12  ;;  %v55_v21 = vmul.f32 %v252_v1, %v149_v13  ;;  %v56_v24 = vmul.f32 %v252_v1, %v152_v16  ;;  %v57_v25 = vmul.f32 %v252_v1, %v153_v17 }
   0x6   :  { %v70_v18 = vadd.f32 %v257_v4, %v50_v10  ;;  %v71_v19 = vadd.f32 %v257_v4, %v51_v11  ;;  %v72_v22 = vadd.f32 %v257_v4, %v52_v14  ;;  %v73_v23 = vadd.f32 %v257_v4, %v53_v15 }
   0x7   :  { %v74_v29 = vadd.f32 %v257_v4, %v54_v20  ;;  %v75_v30 = vadd.f32 %v257_v4, %v55_v21  ;;  %v76_v33 = vadd.f32 %v257_v4, %v56_v24  ;;  %v77_v34 = vadd.f32 %v257_v4, %v57_v25 }
   0x8   :  { %v86_v27 = vmax.f32 %v70_v18, 0.0  ;;  %v87_v28 = vmax.f32 %v71_v19, 0.0  ;;  %v88_v31 = vmax.f32 %v72_v22, 0.0  ;;  %v89_v32 = vmax.f32 %v73_v23, 0.0 }
   0x9   :  { %v90_v37 = vmax.f32 %v74_v29, 0.0  ;;  %v91_v38 = vmax.f32 %v75_v30, 0.0  ;;  %v156_v39 = vunpack.c.l.bf16 %v213_v26  ;;  %v92_v42 = vmax.f32 %v76_v33, 0.0 }
   0xa   :  { %v173_v36 = vpack.c.bf16 %v87_v28, %v86_v27  ;;  %v178_v41 = vpack.c.bf16 %v89_v32, %v88_v31  ;;  %v93_v43 = vmax.f32 %v77_v34, 0.0  ;;  %v157_v44 = vunpack.c.h.bf16 %v213_v26 }
   0xb   :  { %v183_v46 = vpack.c.bf16 %v91_v38, %v90_v37  ;;  %v58_v47 = vmul.f32 %v252_v1, %v156_v39  ;;  %v160_v48 = vunpack.c.l.bf16 %v214_v35  ;;  %v161_v49 = vunpack.c.h.bf16 %v214_v35 }
   0xc   :  { %174 = vst [vmem:[%s339_s3] sm:$0xff] %v173_v36   ;;  %v188_v50 = vpack.c.bf16 %v93_v43, %v92_v42  ;;  %v59_v51 = vmul.f32 %v252_v1, %v157_v44  ;;  %v164_v52 = vunpack.c.l.bf16 %v215_v40  ;;  %v165_v53 = vunpack.c.h.bf16 %v215_v40 }
   0xd   :  { %217 = vst [vmem:[%s339_s3 + $0x8] sm:$0xff] %v178_v41   ;;  %v78_v54 = vadd.f32 %v257_v4, %v58_v47  ;;  %v60_v55 = vmul.f32 %v252_v1, %v160_v48  ;;  %v61_v56 = vmul.f32 %v252_v1, %v161_v49  ;;  %v168_v57 = vunpack.c.l.bf16 %v216_v45 }
   0xe   :  { %218 = vst [vmem:[%s339_s3 + $0x10] sm:$0xff] %v183_v46   ;;  %v79_v58 = vadd.f32 %v257_v4, %v59_v51  ;;  %v62_v59 = vmul.f32 %v252_v1, %v164_v52  ;;  %v63_v60 = vmul.f32 %v252_v1, %v165_v53  ;;  %v169_v61 = vunpack.c.h.bf16 %v216_v45 }
   0xf   :  { %219 = vst [vmem:[%s339_s3 + $0x18] sm:$0xff] %v188_v50   ;;  %v94_v62 = vmax.f32 %v78_v54, 0.0  ;;  %v80_v63 = vadd.f32 %v257_v4, %v60_v55  ;;  %v81_v0 = vadd.f32 %v257_v4, %v61_v56  ;;  %v64_v2 = vmul.f32 %v252_v1, %v168_v57 }
  0x10   :  { %v95_v3 = vmax.f32 %v79_v58, 0.0  ;;  %v82_v5 = vadd.f32 %v257_v4, %v62_v59  ;;  %v83_v6 = vadd.f32 %v257_v4, %v63_v60  ;;  %v65_v7 = vmul.f32 %v252_v1, %v169_v61 }
  0x11   :  { %v96_v8 = vmax.f32 %v80_v63, 0.0  ;;  %v97_v9 = vmax.f32 %v81_v0, 0.0  ;;  %v84_v10 = vadd.f32 %v257_v4, %v64_v2 }
  0x12   :  { %v193_v11 = vpack.c.bf16 %v95_v3, %v94_v62  ;;  %v98_v12 = vmax.f32 %v82_v5, 0.0  ;;  %v99_v13 = vmax.f32 %v83_v6, 0.0  ;;  %v85_v14 = vadd.f32 %v257_v4, %v65_v7 }
  0x13   :  { %v198_v15 = vpack.c.bf16 %v97_v9, %v96_v8  ;;  %v100_v16 = vmax.f32 %v84_v10, 0.0 }
  0x14   :  { %220 = vst [vmem:[%s339_s3 + $0x20] sm:$0xff] %v193_v11   ;;  %v203_v17 = vpack.c.bf16 %v99_v13, %v98_v12  ;;  %v101_v18 = vmax.f32 %v85_v14, 0.0 }
  0x15   :  { %221 = vst [vmem:[%s339_s3 + $0x28] sm:$0xff] %v198_v15  }
  0x16   :  { %222 = vst [vmem:[%s339_s3 + $0x30] sm:$0xff] %v203_v17   ;;  %v208_v1 = vpack.c.bf16 %v101_v18, %v100_v16 }
  0x18   :  { %223 = vst [vmem:[%s339_s3 + $0x38] sm:$0xff] %v208_v1  }

// kernel: resblock_pallas.6
= control target key start
LH: loop header
LB: loop body
LE: loop exit
PB: predicated region body
PF: predicated region fallthrough
CT: control target
= control target key end

     0   :  { %vm115_vm0 = vcmask 1041408   ;;  %vm90_vm1 = vcmask 293888   ;;  %vm258_vm2 = vcmask 1040384   ;;  %s480_s1 = inlined_call_operand.vmem [shape: bf16[36,128], index: 1, kind: input, shape index: {}]   ;;  %s481_s0 = inlined_call_operand.vmem [shape: bf16[128,36], index: 0, kind: input, shape index: {}]   ;;  %s482_s2 = inlined_call_operand.vmem [shape: bf16[128,128], index: 2, kind: output, shape index: {0}]   ;;  %s483_s3 = inlined_call_operand.vmem [shape: f32[1,8,128], index: 3, kind: output, shape index: {1}]  }
   0x1   :  { %v34_v0 = vld [vmem:[%s480_s1 + $0x10] sm:$0x3]  ;;  %v327_v4 = vld [vmem:[%s480_s1 + $0x8] sm:$0xff]  ;;  %v326_v5 = vld [vmem:[%s480_s1] sm:$0xff] }
   0x2   :  { %v84_v1 = vunpack.c.l.b16 %v34_v0  ;;  %v318_v6 = vld [vmem:[%s481_s0] sm:$0xff]  ;;  %v320_v7 = vld [vmem:[%s481_s0 + $0x10] sm:$0xff]  ;;  %v319_v10 = vld [vmem:[%s481_s0 + $0x8] sm:$0xff] }
   0x3   :  { %v322_v8 = vld [vmem:[%s481_s0 + $0x20] sm:$0xff]  ;;  %v324_v9 = vld [vmem:[%s481_s0 + $0x30] sm:$0xff]  ;;  %v321_v11 = vld [vmem:[%s481_s0 + $0x18] sm:$0xff] }
   0x4   :  { %v87_v2 = vpack.c.b16 %v84_v1, %v84_v1  ;;  %v323_v12 = vld [vmem:[%s481_s0 + $0x28] sm:$0xff]  ;;  %v325_v13 = vld [vmem:[%s481_s0 + $0x38] sm:$0xff] }
   0x6   :  { %v117_v3 = vsel %vm115_vm0, %v87_v2, 0 }
   0x7   :  { %124 = vmatpush.bf16.msra.mxu0 %v117_v3  ;;  %375 = vmatpush.bf16.msra.mxu1 %v117_v3 }
   0x8   :  { %376 = vmatpush.bf16.msra.mxu2 %v117_v3  ;;  %377 = vmatpush.bf16.msra.mxu3 %v117_v3 }
   0xb   :  { %125 = vmatpush.bf16.msra.mxu0 %v327_v4  ;;  %378 = vmatpush.bf16.msra.mxu1 %v327_v4 }
   0xc   :  { %379 = vmatpush.bf16.msra.mxu2 %v327_v4  ;;  %380 = vmatpush.bf16.msra.mxu3 %v327_v4 }
   0xf   :  { %126 = vmatpush.bf16.msra.mxu0 %v326_v5  ;;  %381 = vmatpush.bf16.msra.mxu1 %v326_v5 }
  0x10   :  { %382 = vmatpush.bf16.msra.mxu2 %v326_v5  ;;  %383 = vmatpush.bf16.msra.mxu3 %v326_v5 }
  0x12   :  { %310 = vmatmul.msk.bf16.vlgmr.msra.gmra.mxu0 %vm90_vm1, %v318_v6  ;;  %312 = vmatmul.msk.bf16.vlgmr.msra.gmra.mxu1 %vm90_vm1, %v320_v7 }
  0x13   :  { %314 = vmatmul.msk.bf16.vlgmr.msra.gmra.mxu2 %vm90_vm1, %v322_v8  ;;  %316 = vmatmul.msk.bf16.vlgmr.msra.gmra.mxu3 %vm90_vm1, %v324_v9 }
  0x22   :  { %311 = vmatmul.msk.bf16.gmra.mxu0 %vm90_vm1, %v319_v10  ;;  %313 = vmatmul.msk.bf16.gmra.mxu1 %vm90_vm1, %v321_v11 }
  0x23   :  { %315 = vmatmul.msk.bf16.gmra.mxu2 %vm90_vm1, %v323_v12  ;;  %317 = vmatmul.msk.bf16.gmra.mxu3 %vm90_vm1, %v325_v13 }
  0x8f   :  { %v128_v14 = vpop.f32.mrf.mxu0  ;;  %v138_v15 = vpop.f32.mrf.mxu1 }
  0x90   :  { %v221_v29 = vmul.f32 %v128_v14, %v128_v14  ;;  %v225_v43 = vmul.f32 %v138_v15, %v138_v15 }
  0x96   :  { %v148_v16 = vpop.f32.mrf.mxu2  ;;  %v446_v17 = vpop.f32.mrf.mxu3 }
  0x97   :  { %v130_v18 = vpop.f32.mrf.mxu0  ;;  %v140_v19 = vpop.f32.mrf.mxu1  ;;  %v229_v59 = vmul.f32 %v148_v16, %v148_v16  ;;  %v233_v7 = vmul.f32 %v446_v17, %v446_v17 }
  0x98   :  { %v331_v20 = vpack.c.bf16 %v130_v18, %v128_v14  ;;  %v341_v21 = vpack.c.bf16 %v140_v19, %v138_v15  ;;  %v222_v28 = vmul.f32 %v130_v18, %v130_v18  ;;  %v200_v31 = vadd.f32 %v130_v18, %v128_v14 }
  0x99   :  { %v226_v46 = vmul.f32 %v140_v19, %v140_v19 }
  0x9a   :  { %332 = vst [vmem:[%s482_s2] sm:$0xff] %v331_v20   ;;  %v237_v32 = vadd.f32 %v222_v28, %v221_v29 }
  0x9b   :  { %369 = vst [vmem:[%s482_s2 + $0x10] sm:$0xff] %v341_v21  }
  0x9e   :  { %v150_v22 = vpop.f32.mrf.mxu2  ;;  %v160_v23 = vpop.f32.mrf.mxu3 }
  0x9f   :  { %v133_v24 = vpop.f32.mrf.mxu0  ;;  %v143_v25 = vpop.f32.mrf.mxu1  ;;  %v351_v26 = vpack.c.bf16 %v150_v22, %v148_v16  ;;  %v361_v27 = vpack.c.bf16 %v160_v23, %v446_v17  ;;  %v230_v62 = vmul.f32 %v150_v22, %v150_v22  ;;  %v234_v10 = vmul.f32 %v160_v23, %v160_v23 }
  0xa0   :  { %v223_v30 = vmul.f32 %v133_v24, %v133_v24  ;;  %v201_v33 = vadd.f32 %v200_v31, %v133_v24  ;;  %v227_v49 = vmul.f32 %v143_v25, %v143_v25 }
  0xa1   :  { %371 = vst [vmem:[%s482_s2 + $0x20] sm:$0xff] %v351_v26  }
  0xa2   :  { %373 = vst [vmem:[%s482_s2 + $0x30] sm:$0xff] %v361_v27   ;;  %v238_v36 = vadd.f32 %v237_v32, %v223_v30 }
  0xa6   :  { %v153_v34 = vpop.f32.mrf.mxu2  ;;  %v163_v35 = vpop.f32.mrf.mxu3 }
  0xa7   :  { %v135_v37 = vpop.f32.mrf.mxu0  ;;  %v145_v38 = vpop.f32.mrf.mxu1  ;;  %v231_v2 = vmul.f32 %v153_v34, %v153_v34  ;;  %v235_v14 = vmul.f32 %v163_v35, %v163_v35 }
  0xa8   :  { %v336_v39 = vpack.c.bf16 %v135_v37, %v133_v24  ;;  %v202_v40 = vadd.f32 %v201_v33, %v135_v37  ;;  %v224_v41 = vmul.f32 %v135_v37, %v135_v37  ;;  %v346_v42 = vpack.c.bf16 %v145_v38, %v143_v25 }
  0xa9   :  { %v228_v57 = vmul.f32 %v145_v38, %v145_v38 }
  0xaa   :  { %368 = vst [vmem:[%s482_s2 + $0x8] sm:$0xff] %v336_v39   ;;  %v203_v44 = vadd.f32 %v202_v40, %v138_v15  ;;  %v239_v45 = vadd.f32 %v238_v36, %v224_v41 }
  0xab   :  { %370 = vst [vmem:[%s482_s2 + $0x18] sm:$0xff] %v346_v42  }
  0xac   :  { %v240_v47 = vadd.f32 %v239_v45, %v225_v43  ;;  %v204_v48 = vadd.f32 %v203_v44, %v140_v19 }
  0xae   :  { %v205_v50 = vadd.f32 %v204_v48, %v143_v25  ;;  %v241_v51 = vadd.f32 %v240_v47, %v226_v46  ;;  %v155_v52 = vpop.f32.mrf.mxu2  ;;  %v165_v53 = vpop.f32.mrf.mxu3 }
  0xaf   :  { %v356_v54 = vpack.c.bf16 %v155_v52, %v153_v34  ;;  %v366_v55 = vpack.c.bf16 %v165_v53, %v163_v35  ;;  %v232_v6 = vmul.f32 %v155_v52, %v155_v52  ;;  %v236_v19 = vmul.f32 %v165_v53, %v165_v53 }
  0xb0   :  { %v206_v56 = vadd.f32 %v205_v50, %v145_v38  ;;  %v242_v58 = vadd.f32 %v241_v51, %v227_v49 }
  0xb1   :  { %372 = vst [vmem:[%s482_s2 + $0x28] sm:$0xff] %v356_v54  }
  0xb2   :  { %v207_v60 = vadd.f32 %v206_v56, %v148_v16  ;;  %v243_v61 = vadd.f32 %v242_v58, %v228_v57  ;;  %374 = vst [vmem:[%s482_s2 + $0x38] sm:$0xff] %v366_v55  }
  0xb4   :  { %v244_v63 = vadd.f32 %v243_v61, %v229_v59  ;;  %v208_v0 = vadd.f32 %v207_v60, %v150_v22 }
  0xb6   :  { %v209_v1 = vadd.f32 %v208_v0, %v153_v34  ;;  %v245_v3 = vadd.f32 %v244_v63, %v230_v62 }
  0xb8   :  { %v246_v4 = vadd.f32 %v245_v3, %v231_v2  ;;  %v210_v5 = vadd.f32 %v209_v1, %v155_v52 }
  0xba   :  { %v211_v8 = vadd.f32 %v210_v5, %v446_v17  ;;  %v247_v9 = vadd.f32 %v246_v4, %v232_v6 }
  0xbc   :  { %v248_v11 = vadd.f32 %v247_v9, %v233_v7  ;;  %v212_v12 = vadd.f32 %v211_v8, %v160_v23 }
  0xbe   :  { %v213_v13 = vadd.f32 %v212_v12, %v163_v35  ;;  %v249_v15 = vadd.f32 %v248_v11, %v234_v10 }
  0xc0   :  { %v250_v16 = vadd.f32 %v249_v15, %v235_v14  ;;  %v214_v18 = vadd.f32 %v213_v13, %v165_v53 }
  0xc2   :  { %v215_v20 = vrot.slane %v214_v18, 4  ;;  %v251_v21 = vadd.f32 %v250_v16, %v236_v19 }
  0xc4   :  { %v216_v22 = vadd.f32 %v215_v20, %v214_v18  ;;  %v252_v24 = vrot.slane %v251_v21, 4 }
  0xc6   :  { %v217_v25 = vrot.slane %v216_v22, 2  ;;  %v253_v26 = vadd.f32 %v252_v24, %v251_v21 }
  0xc8   :  { %v218_v27 = vadd.f32 %v217_v25, %v216_v22  ;;  %v254_v28 = vrot.slane %v253_v26, 2 }
  0xca   :  { %v219_v29 = vrot.slane %v218_v27, 1  ;;  %v255_v17 = vadd.f32 %v254_v28, %v253_v26 }
  0xcc   :  { %v256_v30 = vrot.slane %v255_v17, 1  ;;  %v220_v31 = vadd.f32 %v219_v29, %v218_v27 }
  0xce   :  { %v257_v23 = vadd.f32 %v256_v30, %v255_v17 }
  0xd0   :  { %v259_v32 = vsel %vm258_vm2, %v220_v31, %v257_v23 }
  0xd1   :  { %v260_v33 = vsel %vm115_vm0, %v259_v32, 0.0 }
  0xd2   :  { %261 = vst [vmem:[%s483_s3] sm:$0xff] %v260_v33 }

// kernel: resblock_pallas.10
= control target key start
LH: loop header
LB: loop body
LE: loop exit
PB: predicated region body
PF: predicated region fallthrough
CT: control target
= control target key end

     0   :  { %vm131_vm0 = vcmask 1043456   ;;  %vm106_vm1 = vcmask 588800   ;;  %vm274_vm2 = vcmask 1040384   ;;  %vm276_vm3 = vcmask 1041408   ;;  %s517_s1 = inlined_call_operand.vmem [shape: bf16[72,128], index: 1, kind: input, shape index: {}]   ;;  %s518_s0 = inlined_call_operand.vmem [shape: bf16[128,72], index: 0, kind: input, shape index: {}]   ;;  %s519_s2 = inlined_call_operand.vmem [shape: bf16[128,128], index: 2, kind: output, shape index: {0}]   ;;  %s520_s3 = inlined_call_operand.vmem [shape: f32[1,8,128], index: 3, kind: output, shape index: {1}]  }
   0x1   :  { %v38_v0 = vld [vmem:[%s517_s1 + $0x20] sm:$0xf]  ;;  %v354_v4 = vld [vmem:[%s517_s1 + $0x18] sm:$0xff]  ;;  %v353_v5 = vld [vmem:[%s517_s1 + $0x10] sm:$0xff] }
   0x2   :  { %v96_v1 = vunpack.c.l.b16 %v38_v0  ;;  %v352_v6 = vld [vmem:[%s517_s1 + $0x8] sm:$0xff]  ;;  %v351_v7 = vld [vmem:[%s517_s1] sm:$0xff]  ;;  %v345_v9 = vld [vmem:[%s518_s0 + $0x10] sm:$0xff] }
   0x3   :  { %v343_v8 = vld [vmem:[%s518_s0] sm:$0xff]  ;;  %v349_v11 = vld [vmem:[%s518_s0 + $0x30] sm:$0xff]  ;;  %v344_v12 = vld [vmem:[%s518_s0 + $0x8] sm:$0xff] }
   0x4   :  { %v101_v2 = vpack.c.b16 %v96_v1, %v96_v1  ;;  %v347_v10 = vld [vmem:[%s518_s0 + $0x20] sm:$0xff]  ;;  %v346_v13 = vld [vmem:[%s518_s0 + $0x18] sm:$0xff]  ;;  %v348_v14 = vld [vmem:[%s518_s0 + $0x28] sm:$0xff] }
   0x5   :  { %v350_v15 = vld [vmem:[%s518_s0 + $0x38] sm:$0xff] }
   0x6   :  { %v133_v3 = vsel %vm131_vm0, %v101_v2, 0 }
   0x7   :  { %138 = vmatpush.bf16.msra.mxu0 %v133_v3  ;;  %402 = vmatpush.bf16.msra.mxu1 %v133_v3 }
   0x8   :  { %403 = vmatpush.bf16.msra.mxu2 %v133_v3  ;;  %404 = vmatpush.bf16.msra.mxu3 %v133_v3 }
   0xb   :  { %139 = vmatpush.bf16.msra.mxu0 %v354_v4  ;;  %405 = vmatpush.bf16.msra.mxu1 %v354_v4 }
   0xc   :  { %406 = vmatpush.bf16.msra.mxu2 %v354_v4  ;;  %407 = vmatpush.bf16.msra.mxu3 %v354_v4 }
   0xf   :  { %140 = vmatpush.bf16.msra.mxu0 %v353_v5  ;;  %408 = vmatpush.bf16.msra.mxu1 %v353_v5 }
  0x10   :  { %409 = vmatpush.bf16.msra.mxu2 %v353_v5  ;;  %410 = vmatpush.bf16.msra.mxu3 %v353_v5 }
  0x13   :  { %141 = vmatpush.bf16.msra.mxu0 %v352_v6  ;;  %411 = vmatpush.bf16.msra.mxu1 %v352_v6 }
  0x14   :  { %412 = vmatpush.bf16.msra.mxu2 %v352_v6  ;;  %413 = vmatpush.bf16.msra.mxu3 %v352_v6 }
  0x17   :  { %142 = vmatpush.bf16.msra.mxu0 %v351_v7  ;;  %414 = vmatpush.bf16.msra.mxu1 %v351_v7 }
  0x18   :  { %415 = vmatpush.bf16.msra.mxu2 %v351_v7  ;;  %416 = vmatpush.bf16.msra.mxu3 %v351_v7 }
  0x1a   :  { %335 = vmatmul.msk.bf16.vlgmr.msra.gmra.mxu0 %vm106_vm1, %v343_v8  ;;  %337 = vmatmul.msk.bf16.vlgmr.msra.gmra.mxu1 %vm106_vm1, %v345_v9 }
  0x1b   :  { %339 = vmatmul.msk.bf16.vlgmr.msra.gmra.mxu2 %vm106_vm1, %v347_v10  ;;  %341 = vmatmul.msk.bf16.vlgmr.msra.gmra.mxu3 %vm106_vm1, %v349_v11 }
  0x2a   :  { %336 = vmatmul.msk.bf16.gmra.mxu0 %vm106_vm1, %v344_v12  ;;  %338 = vmatmul.msk.bf16.gmra.mxu1 %vm106_vm1, %v346_v13 }
  0x2b   :  { %340 = vmatmul.msk.bf16.gmra.mxu2 %vm106_vm1, %v348_v14  ;;  %342 = vmatmul.msk.bf16.gmra.mxu3 %vm106_vm1, %v350_v15 }
  0x97   :  { %v144_v16 = vpop.f32.mrf.mxu0  ;;  %v154_v17 = vpop.f32.mrf.mxu1 }
  0x98   :  { %v237_v31 = vmul.f32 %v144_v16, %v144_v16  ;;  %v241_v45 = vmul.f32 %v154_v17, %v154_v17 }
  0x9e   :  { %v164_v18 = vpop.f32.mrf.mxu2  ;;  %v484_v19 = vpop.f32.mrf.mxu3 }
  0x9f   :  { %v146_v20 = vpop.f32.mrf.mxu0  ;;  %v156_v21 = vpop.f32.mrf.mxu1  ;;  %v245_v61 = vmul.f32 %v164_v18, %v164_v18  ;;  %v249_v9 = vmul.f32 %v484_v19, %v484_v19 }
  0xa0   :  { %v358_v22 = vpack.c.bf16 %v146_v20, %v144_v16  ;;  %v368_v23 = vpack.c.bf16 %v156_v21, %v154_v17  ;;  %v238_v30 = vmul.f32 %v146_v20, %v146_v20  ;;  %v216_v33 = vadd.f32 %v146_v20, %v144_v16 }
  0xa1   :  { %v242_v48 = vmul.f32 %v156_v21, %v156_v21 }
  0xa2   :  { %359 = vst [vmem:[%s519_s2] sm:$0xff] %v358_v22   ;;  %v253_v34 = vadd.f32 %v238_v30, %v237_v31 }
  0xa3   :  { %396 = vst [vmem:[%s519_s2 + $0x10] sm:$0xff] %v368_v23  }
  0xa6   :  { %v166_v24 = vpop.f32.mrf.mxu2  ;;  %v176_v25 = vpop.f32.mrf.mxu3 }
  0xa7   :  { %v149_v26 = vpop.f32.mrf.mxu0  ;;  %v159_v27 = vpop.f32.mrf.mxu1  ;;  %v378_v28 = vpack.c.bf16 %v166_v24, %v164_v18  ;;  %v388_v29 = vpack.c.bf16 %v176_v25, %v484_v19  ;;  %v246_v0 = vmul.f32 %v166_v24, %v166_v24  ;;  %v250_v12 = vmul.f32 %v176_v25, %v176_v25 }
  0xa8   :  { %v239_v32 = vmul.f32 %v149_v26, %v149_v26  ;;  %v217_v35 = vadd.f32 %v216_v33, %v149_v26  ;;  %v243_v51 = vmul.f32 %v159_v27, %v159_v27 }
  0xa9   :  { %398 = vst [vmem:[%s519_s2 + $0x20] sm:$0xff] %v378_v28  }
  0xaa   :  { %400 = vst [vmem:[%s519_s2 + $0x30] sm:$0xff] %v388_v29   ;;  %v254_v38 = vadd.f32 %v253_v34, %v239_v32 }
  0xae   :  { %v169_v36 = vpop.f32.mrf.mxu2  ;;  %v179_v37 = vpop.f32.mrf.mxu3 }
  0xaf   :  { %v151_v39 = vpop.f32.mrf.mxu0  ;;  %v161_v40 = vpop.f32.mrf.mxu1  ;;  %v247_v4 = vmul.f32 %v169_v36, %v169_v36  ;;  %v251_v16 = vmul.f32 %v179_v37, %v179_v37 }
  0xb0   :  { %v363_v41 = vpack.c.bf16 %v151_v39, %v149_v26  ;;  %v218_v42 = vadd.f32 %v217_v35, %v151_v39  ;;  %v240_v43 = vmul.f32 %v151_v39, %v151_v39  ;;  %v373_v44 = vpack.c.bf16 %v161_v40, %v159_v27 }
  0xb1   :  { %v244_v59 = vmul.f32 %v161_v40, %v161_v40 }
  0xb2   :  { %395 = vst [vmem:[%s519_s2 + $0x8] sm:$0xff] %v363_v41   ;;  %v219_v46 = vadd.f32 %v218_v42, %v154_v17  ;;  %v255_v47 = vadd.f32 %v254_v38, %v240_v43 }
  0xb3   :  { %397 = vst [vmem:[%s519_s2 + $0x18] sm:$0xff] %v373_v44  }
  0xb4   :  { %v256_v49 = vadd.f32 %v255_v47, %v241_v45  ;;  %v220_v50 = vadd.f32 %v219_v46, %v156_v21 }
  0xb6   :  { %v221_v52 = vadd.f32 %v220_v50, %v159_v27  ;;  %v257_v53 = vadd.f32 %v256_v49, %v242_v48  ;;  %v171_v54 = vpop.f32.mrf.mxu2  ;;  %v181_v55 = vpop.f32.mrf.mxu3 }
  0xb7   :  { %v383_v56 = vpack.c.bf16 %v171_v54, %v169_v36  ;;  %v393_v57 = vpack.c.bf16 %v181_v55, %v179_v37  ;;  %v248_v8 = vmul.f32 %v171_v54, %v171_v54  ;;  %v252_v21 = vmul.f32 %v181_v55, %v181_v55 }
  0xb8   :  { %v222_v58 = vadd.f32 %v221_v52, %v161_v40  ;;  %v258_v60 = vadd.f32 %v257_v53, %v243_v51 }
  0xb9   :  { %399 = vst [vmem:[%s519_s2 + $0x28] sm:$0xff] %v383_v56  }
  0xba   :  { %v223_v62 = vadd.f32 %v222_v58, %v164_v18  ;;  %v259_v63 = vadd.f32 %v258_v60, %v244_v59  ;;  %401 = vst [vmem:[%s519_s2 + $0x38] sm:$0xff] %v393_v57  }
  0xbc   :  { %v260_v1 = vadd.f32 %v259_v63, %v245_v61  ;;  %v224_v2 = vadd.f32 %v223_v62, %v166_v24 }
  0xbe   :  { %v225_v3 = vadd.f32 %v224_v2, %v169_v36  ;;  %v261_v5 = vadd.f32 %v260_v1, %v246_v0 }
  0xc0   :  { %v262_v6 = vadd.f32 %v261_v5, %v247_v4  ;;  %v226_v7 = vadd.f32 %v225_v3, %v171_v54 }
  0xc2   :  { %v227_v10 = vadd.f32 %v226_v7, %v484_v19  ;;  %v263_v11 = vadd.f32 %v262_v6, %v248_v8 }
  0xc4   :  { %v264_v13 = vadd.f32 %v263_v11, %v249_v9  ;;  %v228_v14 = vadd.f32 %v227_v10, %v176_v25 }
  0xc6   :  { %v229_v15 = vadd.f32 %v228_v14, %v179_v37  ;;  %v265_v17 = vadd.f32 %v264_v13, %v250_v12 }
  0xc8   :  { %v266_v18 = vadd.f32 %v265_v17, %v251_v16  ;;  %v230_v20 = vadd.f32 %v229_v15, %v181_v55 }
  0xca   :  { %v231_v22 = vrot.slane %v230_v20, 4  ;;  %v267_v23 = vadd.f32 %v266_v18, %v252_v21 }
  0xcc   :  { %v232_v24 = vadd.f32 %v231_v22, %v230_v20  ;;  %v268_v26 = vrot.slane %v267_v23, 4 }
  0xce   :  { %v233_v27 = vrot.slane %v232_v24, 2  ;;  %v269_v28 = vadd.f32 %v268_v26, %v267_v23 }
  0xd0   :  { %v234_v29 = vadd.f32 %v233_v27, %v232_v24  ;;  %v270_v30 = vrot.slane %v269_v28, 2 }
  0xd2   :  { %v235_v31 = vrot.slane %v234_v29, 1  ;;  %v271_v19 = vadd.f32 %v270_v30, %v269_v28 }
  0xd4   :  { %v272_v32 = vrot.slane %v271_v19, 1  ;;  %v236_v33 = vadd.f32 %v235_v31, %v234_v29 }
  0xd6   :  { %v273_v25 = vadd.f32 %v272_v32, %v271_v19 }
  0xd8   :  { %v275_v34 = vsel %vm274_vm2, %v236_v33, %v273_v25 }
  0xd9   :  { %v277_v35 = vsel %vm276_vm3, %v275_v34, 0.0 }
  0xda   :  { %278 = vst [vmem:[%s520_s3] sm:$0xff] %v277_v35 }

// kernel: resblock_pallas.9
= control target key start
LH: loop header
LB: loop body
LE: loop exit
PB: predicated region body
PF: predicated region fallthrough
CT: control target
= control target key end

     0   :  { %s320_s0 = inlined_call_operand.vmem [shape: bf16[128,128], index: 0, kind: input, shape index: {}]   ;;  %s321_s1 = inlined_call_operand.vmem [shape: f32[1,128], index: 1, kind: input, shape index: {}]   ;;  %s322_s2 = inlined_call_operand.vmem [shape: f32[1,128], index: 2, kind: input, shape index: {}]   ;;  %s323_s3 = inlined_call_operand.vmem [shape: bf16[128,128], index: 3, kind: output, shape index: {}]  }
   0x1   :  { %v123_v0 = vld [vmem:[%s320_s0] sm:$0xff]   ;;  %v194_v5 = vld [vmem:[%s320_s0 + $0x8] sm:$0xff]   ;;  %v195_v8 = vld [vmem:[%s320_s0 + $0x10] sm:$0xff]  }
   0x2   :  { %v236_v1 = vld [vmem:[%s321_s1] ss:$0 sm:$0xff]  ;;  %v124_v2 = vunpack.c.l.bf16 %v123_v0  ;;  %v125_v3 = vunpack.c.h.bf16 %v123_v0  ;;  %v128_v6 = vunpack.c.l.bf16 %v194_v5  ;;  %v129_v7 = vunpack.c.h.bf16 %v194_v5  ;;  %v196_v9 = vld [vmem:[%s320_s0 + $0x18] sm:$0xff]   ;;  %v198_v27 = vld [vmem:[%s320_s0 + $0x28] sm:$0xff]  }
   0x3   :  { %v241_v4 = vld [vmem:[%s322_s2] ss:$0 sm:$0xff]  ;;  %v132_v12 = vunpack.c.l.bf16 %v195_v8  ;;  %v133_v13 = vunpack.c.h.bf16 %v195_v8  ;;  %v136_v16 = vunpack.c.l.bf16 %v196_v9  ;;  %v137_v17 = vunpack.c.h.bf16 %v196_v9  ;;  %v199_v32 = vld [vmem:[%s320_s0 + $0x30] sm:$0xff]   ;;  %v200_v37 = vld [vmem:[%s320_s0 + $0x38] sm:$0xff]  }
   0x4   :  { %v50_v10 = vmul.f32 %v236_v1, %v124_v2  ;;  %v51_v11 = vmul.f32 %v236_v1, %v125_v3  ;;  %v52_v14 = vmul.f32 %v236_v1, %v128_v6  ;;  %v53_v15 = vmul.f32 %v236_v1, %v129_v7  ;;  %v197_v18 = vld [vmem:[%s320_s0 + $0x20] sm:$0xff]  }
   0x5   :  { %v54_v21 = vmul.f32 %v236_v1, %v132_v12  ;;  %v55_v22 = vmul.f32 %v236_v1, %v133_v13  ;;  %v56_v25 = vmul.f32 %v236_v1, %v136_v16  ;;  %v57_v26 = vmul.f32 %v236_v1, %v137_v17 }
   0x6   :  { %v70_v19 = vadd.f32 %v241_v4, %v50_v10  ;;  %v71_v20 = vadd.f32 %v241_v4, %v51_v11  ;;  %v72_v23 = vadd.f32 %v241_v4, %v52_v14  ;;  %v73_v24 = vadd.f32 %v241_v4, %v53_v15 }
   0x7   :  { %v74_v29 = vadd.f32 %v241_v4, %v54_v21  ;;  %v75_v30 = vadd.f32 %v241_v4, %v55_v22  ;;  %v140_v31 = vunpack.c.l.bf16 %v197_v18  ;;  %v76_v34 = vadd.f32 %v241_v4, %v56_v25 }
   0x8   :  { %v157_v28 = vpack.c.bf16 %v71_v20, %v70_v19  ;;  %v162_v33 = vpack.c.bf16 %v73_v24, %v72_v23  ;;  %v77_v35 = vadd.f32 %v241_v4, %v57_v26  ;;  %v141_v36 = vunpack.c.h.bf16 %v197_v18 }
   0x9   :  { %v167_v38 = vpack.c.bf16 %v75_v30, %v74_v29  ;;  %v58_v39 = vmul.f32 %v236_v1, %v140_v31  ;;  %v144_v40 = vunpack.c.l.bf16 %v198_v27  ;;  %v145_v41 = vunpack.c.h.bf16 %v198_v27 }
   0xa   :  { %158 = vst [vmem:[%s323_s3] sm:$0xff] %v157_v28   ;;  %v172_v42 = vpack.c.bf16 %v77_v35, %v76_v34  ;;  %v59_v43 = vmul.f32 %v236_v1, %v141_v36  ;;  %v148_v44 = vunpack.c.l.bf16 %v199_v32  ;;  %v149_v45 = vunpack.c.h.bf16 %v199_v32 }
   0xb   :  { %201 = vst [vmem:[%s323_s3 + $0x8] sm:$0xff] %v162_v33   ;;  %v78_v46 = vadd.f32 %v241_v4, %v58_v39  ;;  %v60_v47 = vmul.f32 %v236_v1, %v144_v40  ;;  %v61_v48 = vmul.f32 %v236_v1, %v145_v41  ;;  %v152_v49 = vunpack.c.l.bf16 %v200_v37 }
   0xc   :  { %202 = vst [vmem:[%s323_s3 + $0x10] sm:$0xff] %v167_v38   ;;  %v79_v50 = vadd.f32 %v241_v4, %v59_v43  ;;  %v62_v51 = vmul.f32 %v236_v1, %v148_v44  ;;  %v63_v52 = vmul.f32 %v236_v1, %v149_v45  ;;  %v153_v53 = vunpack.c.h.bf16 %v200_v37 }
   0xd   :  { %203 = vst [vmem:[%s323_s3 + $0x18] sm:$0xff] %v172_v42   ;;  %v80_v54 = vadd.f32 %v241_v4, %v60_v47  ;;  %v81_v55 = vadd.f32 %v241_v4, %v61_v48  ;;  %v64_v56 = vmul.f32 %v236_v1, %v152_v49 }
   0xe   :  { %v177_v57 = vpack.c.bf16 %v79_v50, %v78_v46  ;;  %v82_v58 = vadd.f32 %v241_v4, %v62_v51  ;;  %v83_v59 = vadd.f32 %v241_v4, %v63_v52  ;;  %v65_v60 = vmul.f32 %v236_v1, %v153_v53 }
   0xf   :  { %v182_v61 = vpack.c.bf16 %v81_v55, %v80_v54  ;;  %v84_v62 = vadd.f32 %v241_v4, %v64_v56 }
  0x10   :  { %204 = vst [vmem:[%s323_s3 + $0x20] sm:$0xff] %v177_v57   ;;  %v187_v63 = vpack.c.bf16 %v83_v59, %v82_v58  ;;  %v85_v0 = vadd.f32 %v241_v4, %v65_v60 }
  0x11   :  { %205 = vst [vmem:[%s323_s3 + $0x28] sm:$0xff] %v182_v61  }
  0x12   :  { %206 = vst [vmem:[%s323_s3 + $0x30] sm:$0xff] %v187_v63   ;;  %v192_v2 = vpack.c.bf16 %v85_v0, %v84_v62 }
  0x14   :  { %207 = vst [vmem:[%s323_s3 + $0x38] sm:$0xff] %v192_v2  }

// kernel: resblock_pallas.8
= control target key start
LH: loop header
LB: loop body
LE: loop exit
PB: predicated region body
PF: predicated region fallthrough
CT: control target
= control target key end

     0   :  { %vm96_vm0 = vcmask 1041408   ;;  %vm71_vm1 = vcmask 31744   ;;  %vm239_vm2 = vcmask 1040384   ;;  %s439_s1 = inlined_call_operand.vmem [shape: bf16[4,128], index: 1, kind: input, shape index: {}]   ;;  %s440_s0 = inlined_call_operand.vmem [shape: bf16[128,4], index: 0, kind: input, shape index: {}]   ;;  %s441_s2 = inlined_call_operand.vmem [shape: bf16[128,128], index: 2, kind: output, shape index: {0}]   ;;  %s442_s3 = inlined_call_operand.vmem [shape: f32[1,8,128], index: 3, kind: output, shape index: {1}]  }
   0x1   :  { %v30_v0 = vld [vmem:[%s439_s1] sm:$0x3]  ;;  %v293_v3 = vld [vmem:[%s440_s0 + $0x10] sm:$0xff]  ;;  %v292_v6 = vld [vmem:[%s440_s0 + $0x8] sm:$0xff] }
   0x2   :  { %v98_v1 = vsel %vm96_vm0, %v30_v0, 0  ;;  %v291_v2 = vld [vmem:[%s440_s0] sm:$0xff]  ;;  %v297_v5 = vld [vmem:[%s440_s0 + $0x30] sm:$0xff]  ;;  %v294_v7 = vld [vmem:[%s440_s0 + $0x18] sm:$0xff] }
   0x3   :  { %107 = vmatpush.bf16.msra.mxu0 %v98_v1  ;;  %346 = vmatpush.bf16.msra.mxu1 %v98_v1  ;;  %v295_v4 = vld [vmem:[%s440_s0 + $0x20] sm:$0xff]  ;;  %v296_v8 = vld [vmem:[%s440_s0 + $0x28] sm:$0xff]  ;;  %v298_v9 = vld [vmem:[%s440_s0 + $0x38] sm:$0xff] }
   0x4   :  { %347 = vmatpush.bf16.msra.mxu2 %v98_v1  ;;  %348 = vmatpush.bf16.msra.mxu3 %v98_v1 }
   0x6   :  { %283 = vmatmul.msk.bf16.vlgmr.msra.gmra.mxu0 %vm71_vm1, %v291_v2  ;;  %285 = vmatmul.msk.bf16.vlgmr.msra.gmra.mxu1 %vm71_vm1, %v293_v3 }
   0x7   :  { %287 = vmatmul.msk.bf16.vlgmr.msra.gmra.mxu2 %vm71_vm1, %v295_v4  ;;  %289 = vmatmul.msk.bf16.vlgmr.msra.gmra.mxu3 %vm71_vm1, %v297_v5 }
  0x16   :  { %284 = vmatmul.msk.bf16.gmra.mxu0 %vm71_vm1, %v292_v6  ;;  %286 = vmatmul.msk.bf16.gmra.mxu1 %vm71_vm1, %v294_v7 }
  0x17   :  { %288 = vmatmul.msk.bf16.gmra.mxu2 %vm71_vm1, %v296_v8  ;;  %290 = vmatmul.msk.bf16.gmra.mxu3 %vm71_vm1, %v298_v9 }
  0x83   :  { %v109_v10 = vpop.f32.mrf.mxu0  ;;  %v119_v11 = vpop.f32.mrf.mxu1 }
  0x84   :  { %v202_v25 = vmul.f32 %v109_v10, %v109_v10  ;;  %v206_v39 = vmul.f32 %v119_v11, %v119_v11 }
  0x8a   :  { %v129_v12 = vpop.f32.mrf.mxu2  ;;  %v405_v13 = vpop.f32.mrf.mxu3 }
  0x8b   :  { %v111_v14 = vpop.f32.mrf.mxu0  ;;  %v121_v15 = vpop.f32.mrf.mxu1  ;;  %v210_v55 = vmul.f32 %v129_v12, %v129_v12  ;;  %v214_v3 = vmul.f32 %v405_v13, %v405_v13 }
  0x8c   :  { %v302_v16 = vpack.c.bf16 %v111_v14, %v109_v10  ;;  %v312_v17 = vpack.c.bf16 %v121_v15, %v119_v11  ;;  %v203_v24 = vmul.f32 %v111_v14, %v111_v14  ;;  %v181_v27 = vadd.f32 %v111_v14, %v109_v10 }
  0x8d   :  { %v207_v42 = vmul.f32 %v121_v15, %v121_v15 }
  0x8e   :  { %303 = vst [vmem:[%s441_s2] sm:$0xff] %v302_v16   ;;  %v218_v28 = vadd.f32 %v203_v24, %v202_v25 }
  0x8f   :  { %340 = vst [vmem:[%s441_s2 + $0x10] sm:$0xff] %v312_v17  }
  0x92   :  { %v131_v18 = vpop.f32.mrf.mxu2  ;;  %v141_v19 = vpop.f32.mrf.mxu3 }
  0x93   :  { %v114_v20 = vpop.f32.mrf.mxu0  ;;  %v124_v21 = vpop.f32.mrf.mxu1  ;;  %v322_v22 = vpack.c.bf16 %v131_v18, %v129_v12  ;;  %v332_v23 = vpack.c.bf16 %v141_v19, %v405_v13  ;;  %v211_v58 = vmul.f32 %v131_v18, %v131_v18  ;;  %v215_v6 = vmul.f32 %v141_v19, %v141_v19 }
  0x94   :  { %v204_v26 = vmul.f32 %v114_v20, %v114_v20  ;;  %v182_v29 = vadd.f32 %v181_v27, %v114_v20  ;;  %v208_v45 = vmul.f32 %v124_v21, %v124_v21 }
  0x95   :  { %342 = vst [vmem:[%s441_s2 + $0x20] sm:$0xff] %v322_v22  }
  0x96   :  { %344 = vst [vmem:[%s441_s2 + $0x30] sm:$0xff] %v332_v23   ;;  %v219_v32 = vadd.f32 %v218_v28, %v204_v26 }
  0x9a   :  { %v134_v30 = vpop.f32.mrf.mxu2  ;;  %v144_v31 = vpop.f32.mrf.mxu3 }
  0x9b   :  { %v116_v33 = vpop.f32.mrf.mxu0  ;;  %v126_v34 = vpop.f32.mrf.mxu1  ;;  %v212_v62 = vmul.f32 %v134_v30, %v134_v30  ;;  %v216_v10 = vmul.f32 %v144_v31, %v144_v31 }
  0x9c   :  { %v307_v35 = vpack.c.bf16 %v116_v33, %v114_v20  ;;  %v183_v36 = vadd.f32 %v182_v29, %v116_v33  ;;  %v205_v37 = vmul.f32 %v116_v33, %v116_v33  ;;  %v317_v38 = vpack.c.bf16 %v126_v34, %v124_v21 }
  0x9d   :  { %v209_v53 = vmul.f32 %v126_v34, %v126_v34 }
  0x9e   :  { %339 = vst [vmem:[%s441_s2 + $0x8] sm:$0xff] %v307_v35   ;;  %v184_v40 = vadd.f32 %v183_v36, %v119_v11  ;;  %v220_v41 = vadd.f32 %v219_v32, %v205_v37 }
  0x9f   :  { %341 = vst [vmem:[%s441_s2 + $0x18] sm:$0xff] %v317_v38  }
  0xa0   :  { %v221_v43 = vadd.f32 %v220_v41, %v206_v39  ;;  %v185_v44 = vadd.f32 %v184_v40, %v121_v15 }
  0xa2   :  { %v186_v46 = vadd.f32 %v185_v44, %v124_v21  ;;  %v222_v47 = vadd.f32 %v221_v43, %v207_v42  ;;  %v136_v48 = vpop.f32.mrf.mxu2  ;;  %v146_v49 = vpop.f32.mrf.mxu3 }
  0xa3   :  { %v327_v50 = vpack.c.bf16 %v136_v48, %v134_v30  ;;  %v337_v51 = vpack.c.bf16 %v146_v49, %v144_v31  ;;  %v213_v2 = vmul.f32 %v136_v48, %v136_v48  ;;  %v217_v15 = vmul.f32 %v146_v49, %v146_v49 }
  0xa4   :  { %v187_v52 = vadd.f32 %v186_v46, %v126_v34  ;;  %v223_v54 = vadd.f32 %v222_v47, %v208_v45 }
  0xa5   :  { %343 = vst [vmem:[%s441_s2 + $0x28] sm:$0xff] %v327_v50  }
  0xa6   :  { %v188_v56 = vadd.f32 %v187_v52, %v129_v12  ;;  %v224_v57 = vadd.f32 %v223_v54, %v209_v53  ;;  %345 = vst [vmem:[%s441_s2 + $0x38] sm:$0xff] %v337_v51  }
  0xa8   :  { %v225_v59 = vadd.f32 %v224_v57, %v210_v55  ;;  %v189_v60 = vadd.f32 %v188_v56, %v131_v18 }
  0xaa   :  { %v190_v61 = vadd.f32 %v189_v60, %v134_v30  ;;  %v226_v63 = vadd.f32 %v225_v59, %v211_v58 }
  0xac   :  { %v227_v0 = vadd.f32 %v226_v63, %v212_v62  ;;  %v191_v1 = vadd.f32 %v190_v61, %v136_v48 }
  0xae   :  { %v192_v4 = vadd.f32 %v191_v1, %v405_v13  ;;  %v228_v5 = vadd.f32 %v227_v0, %v213_v2 }
  0xb0   :  { %v229_v7 = vadd.f32 %v228_v5, %v214_v3  ;;  %v193_v8 = vadd.f32 %v192_v4, %v141_v19 }
  0xb2   :  { %v194_v9 = vadd.f32 %v193_v8, %v144_v31  ;;  %v230_v11 = vadd.f32 %v229_v7, %v215_v6 }
  0xb4   :  { %v231_v12 = vadd.f32 %v230_v11, %v216_v10  ;;  %v195_v14 = vadd.f32 %v194_v9, %v146_v49 }
  0xb6   :  { %v196_v16 = vrot.slane %v195_v14, 4  ;;  %v232_v17 = vadd.f32 %v231_v12, %v217_v15 }
  0xb8   :  { %v197_v18 = vadd.f32 %v196_v16, %v195_v14  ;;  %v233_v20 = vrot.slane %v232_v17, 4 }
  0xba   :  { %v198_v21 = vrot.slane %v197_v18, 2  ;;  %v234_v22 = vadd.f32 %v233_v20, %v232_v17 }
  0xbc   :  { %v199_v23 = vadd.f32 %v198_v21, %v197_v18  ;;  %v235_v24 = vrot.slane %v234_v22, 2 }
  0xbe   :  { %v200_v25 = vrot.slane %v199_v23, 1  ;;  %v236_v13 = vadd.f32 %v235_v24, %v234_v22 }
  0xc0   :  { %v237_v26 = vrot.slane %v236_v13, 1  ;;  %v201_v27 = vadd.f32 %v200_v25, %v199_v23 }
  0xc2   :  { %v238_v19 = vadd.f32 %v237_v26, %v236_v13 }
  0xc4   :  { %v240_v28 = vsel %vm239_vm2, %v201_v27, %v238_v19 }
  0xc5   :  { %v241_v29 = vsel %vm96_vm0, %v240_v28, 0.0 }
  0xc6   :  { %242 = vst [vmem:[%s442_s3] sm:$0xff] %v241_v29 }

// kernel: resblock_pallas.11
= control target key start
LH: loop header
LB: loop body
LE: loop exit
PB: predicated region body
PF: predicated region fallthrough
CT: control target
= control target key end

     0   :  { %s471_s0 = inlined_call_operand.vmem [shape: bf16[128,128], index: 0, kind: input, shape index: {}]   ;;  %s472_s1 = inlined_call_operand.vmem [shape: f32[1,128], index: 1, kind: input, shape index: {}]   ;;  %s473_s2 = inlined_call_operand.vmem [shape: f32[1,128], index: 2, kind: input, shape index: {}]   ;;  %s474_s3 = inlined_call_operand.vmem [shape: bf16[128,128], index: 3, kind: input, shape index: {}]   ;;  %s475_s4 = inlined_call_operand.vmem [shape: bf16[128,128], index: 4, kind: output, shape index: {}]  }
   0x1   :  { %v206_v0 = vld [vmem:[%s471_s0] sm:$0xff]   ;;  %v309_v8 = vld [vmem:[%s471_s0 + $0x8] sm:$0xff]   ;;  %v310_v10 = vld [vmem:[%s471_s0 + $0x10] sm:$0xff]  }
   0x2   :  { %v363_v1 = vld [vmem:[%s472_s1] ss:$0 sm:$0xff]  ;;  %v207_v2 = vunpack.c.l.bf16 %v206_v0  ;;  %v208_v3 = vunpack.c.h.bf16 %v206_v0  ;;  %v316_v9 = vld [vmem:[%s474_s3 + $0x8] sm:$0xff]   ;;  %v211_v13 = vunpack.c.l.bf16 %v309_v8  ;;  %v212_v14 = vunpack.c.h.bf16 %v309_v8  ;;  %v317_v15 = vld [vmem:[%s474_s3 + $0x10] sm:$0xff]  }
   0x3   :  { %v368_v4 = vld [vmem:[%s473_s2] ss:$0 sm:$0xff]  ;;  %v243_v16 = vunpack.c.l.bf16 %v316_v9  ;;  %v244_v17 = vunpack.c.h.bf16 %v316_v9  ;;  %v215_v18 = vunpack.c.l.bf16 %v310_v10  ;;  %v216_v19 = vunpack.c.h.bf16 %v310_v10  ;;  %v311_v24 = vld [vmem:[%s471_s0 + $0x18] sm:$0xff]   ;;  %v313_v0 = vld [vmem:[%s471_s0 + $0x28] sm:$0xff]  }
   0x4   :  { %v238_v5 = vld [vmem:[%s474_s3] sm:$0xff]   ;;  %v53_v11 = vmul.f32 %v363_v1, %v207_v2  ;;  %v54_v12 = vmul.f32 %v363_v1, %v208_v3  ;;  %v55_v22 = vmul.f32 %v363_v1, %v211_v13  ;;  %v56_v23 = vmul.f32 %v363_v1, %v212_v14  ;;  %v318_v45 = vld [vmem:[%s474_s3 + $0x18] sm:$0xff]  }
   0x5   :  { %v239_v6 = vunpack.c.l.bf16 %v238_v5  ;;  %v240_v7 = vunpack.c.h.bf16 %v238_v5  ;;  %v57_v25 = vmul.f32 %v363_v1, %v215_v18  ;;  %v58_v26 = vmul.f32 %v363_v1, %v216_v19  ;;  %v312_v54 = vld [vmem:[%s471_s0 + $0x20] sm:$0xff]  }
   0x6   :  { %v73_v20 = vadd.f32 %v368_v4, %v53_v11  ;;  %v74_v21 = vadd.f32 %v368_v4, %v54_v12  ;;  %v247_v27 = vunpack.c.l.bf16 %v317_v15  ;;  %v248_v28 = vunpack.c.h.bf16 %v317_v15  ;;  %v319_v59 = vld [vmem:[%s474_s3 + $0x20] sm:$0xff]  }
   0x7   :  { %v75_v31 = vadd.f32 %v368_v4, %v55_v22  ;;  %v76_v32 = vadd.f32 %v368_v4, %v56_v23  ;;  %v77_v33 = vadd.f32 %v368_v4, %v57_v25  ;;  %v78_v34 = vadd.f32 %v368_v4, %v58_v26 }
   0x8   :  { %v89_v29 = vmax.f32 %v73_v20, 0.0  ;;  %v90_v30 = vmax.f32 %v74_v21, 0.0  ;;  %v219_v35 = vunpack.c.l.bf16 %v311_v24  ;;  %v220_v36 = vunpack.c.h.bf16 %v311_v24 }
   0x9   :  { %v91_v39 = vmax.f32 %v75_v31, 0.0  ;;  %v92_v40 = vmax.f32 %v76_v32, 0.0  ;;  %v93_v41 = vmax.f32 %v77_v33, 0.0  ;;  %v94_v42 = vmax.f32 %v78_v34, 0.0 }
   0xa   :  { %v137_v37 = vadd.f32 %v239_v6, %v89_v29  ;;  %v138_v38 = vadd.f32 %v240_v7, %v90_v30  ;;  %v59_v43 = vmul.f32 %v363_v1, %v219_v35  ;;  %v60_v44 = vmul.f32 %v363_v1, %v220_v36  ;;  %v320_v7 = vld [vmem:[%s474_s3 + $0x28] sm:$0xff]   ;;  %v315_v30 = vld [vmem:[%s471_s0 + $0x38] sm:$0xff]  }
   0xb   :  { %v139_v48 = vadd.f32 %v243_v16, %v91_v39  ;;  %v140_v49 = vadd.f32 %v244_v17, %v92_v40  ;;  %v141_v50 = vadd.f32 %v247_v27, %v93_v41  ;;  %v142_v51 = vadd.f32 %v248_v28, %v94_v42  ;;  %v314_v16 = vld [vmem:[%s471_s0 + $0x30] sm:$0xff]  }
   0xc   :  { %v153_v46 = vmax.f32 %v137_v37, 0.0  ;;  %v154_v47 = vmax.f32 %v138_v38, 0.0  ;;  %v79_v52 = vadd.f32 %v368_v4, %v59_v43  ;;  %v80_v53 = vadd.f32 %v368_v4, %v60_v44  ;;  %v321_v17 = vld [vmem:[%s474_s3 + $0x30] sm:$0xff]  }
   0xd   :  { %v155_v56 = vmax.f32 %v139_v48, 0.0  ;;  %v156_v57 = vmax.f32 %v140_v49, 0.0  ;;  %v251_v58 = vunpack.c.l.bf16 %v318_v45  ;;  %v157_v60 = vmax.f32 %v141_v50, 0.0 }
   0xe   :  { %v272_v55 = vpack.c.bf16 %v154_v47, %v153_v46  ;;  %v158_v61 = vmax.f32 %v142_v51, 0.0  ;;  %v95_v62 = vmax.f32 %v79_v52, 0.0  ;;  %v96_v63 = vmax.f32 %v80_v53, 0.0  ;;  %v322_v47 = vld [vmem:[%s474_s3 + $0x38] sm:$0xff]  }
   0xf   :  { %v277_v2 = vpack.c.bf16 %v156_v57, %v155_v56  ;;  %v252_v3 = vunpack.c.h.bf16 %v318_v45  ;;  %v223_v5 = vunpack.c.l.bf16 %v312_v54  ;;  %v224_v6 = vunpack.c.h.bf16 %v312_v54 }
  0x10   :  { %273 = vst [vmem:[%s475_s4] sm:$0xff] %v272_v55   ;;  %v282_v8 = vpack.c.bf16 %v158_v61, %v157_v60  ;;  %v143_v9 = vadd.f32 %v251_v58, %v95_v62  ;;  %v255_v10 = vunpack.c.l.bf16 %v319_v59  ;;  %v256_v11 = vunpack.c.h.bf16 %v319_v59 }
  0x11   :  { %323 = vst [vmem:[%s475_s4 + $0x8] sm:$0xff] %v277_v2   ;;  %v144_v12 = vadd.f32 %v252_v3, %v96_v63  ;;  %v61_v13 = vmul.f32 %v363_v1, %v223_v5  ;;  %v62_v14 = vmul.f32 %v363_v1, %v224_v6  ;;  %v227_v15 = vunpack.c.l.bf16 %v313_v0 }
  0x12   :  { %324 = vst [vmem:[%s475_s4 + $0x10] sm:$0xff] %v282_v8   ;;  %v159_v18 = vmax.f32 %v143_v9, 0.0  ;;  %v228_v19 = vunpack.c.h.bf16 %v313_v0  ;;  %v259_v20 = vunpack.c.l.bf16 %v320_v7  ;;  %v260_v21 = vunpack.c.h.bf16 %v320_v7 }
  0x13   :  { %v160_v22 = vmax.f32 %v144_v12, 0.0  ;;  %v81_v23 = vadd.f32 %v368_v4, %v61_v13  ;;  %v82_v24 = vadd.f32 %v368_v4, %v62_v14  ;;  %v63_v25 = vmul.f32 %v363_v1, %v227_v15 }
  0x14   :  { %v64_v26 = vmul.f32 %v363_v1, %v228_v19  ;;  %v231_v27 = vunpack.c.l.bf16 %v314_v16  ;;  %v232_v28 = vunpack.c.h.bf16 %v314_v16  ;;  %v263_v29 = vunpack.c.l.bf16 %v321_v17 }
  0x15   :  { %v287_v31 = vpack.c.bf16 %v160_v22, %v159_v18  ;;  %v97_v32 = vmax.f32 %v81_v23, 0.0  ;;  %v98_v33 = vmax.f32 %v82_v24, 0.0  ;;  %v83_v34 = vadd.f32 %v368_v4, %v63_v25 }
  0x16   :  { %v84_v35 = vadd.f32 %v368_v4, %v64_v26  ;;  %v65_v36 = vmul.f32 %v363_v1, %v231_v27  ;;  %v66_v37 = vmul.f32 %v363_v1, %v232_v28  ;;  %v264_v38 = vunpack.c.h.bf16 %v321_v17 }
  0x17   :  { %325 = vst [vmem:[%s475_s4 + $0x18] sm:$0xff] %v287_v31   ;;  %v145_v39 = vadd.f32 %v255_v10, %v97_v32  ;;  %v146_v40 = vadd.f32 %v256_v11, %v98_v33  ;;  %v99_v41 = vmax.f32 %v83_v34, 0.0  ;;  %v235_v42 = vunpack.c.l.bf16 %v315_v30 }
  0x18   :  { %v100_v43 = vmax.f32 %v84_v35, 0.0  ;;  %v85_v44 = vadd.f32 %v368_v4, %v65_v36  ;;  %v86_v45 = vadd.f32 %v368_v4, %v66_v37  ;;  %v236_v46 = vunpack.c.h.bf16 %v315_v30 }
  0x19   :  { %v161_v48 = vmax.f32 %v145_v39, 0.0  ;;  %v162_v49 = vmax.f32 %v146_v40, 0.0  ;;  %v147_v50 = vadd.f32 %v259_v20, %v99_v41  ;;  %v67_v51 = vmul.f32 %v363_v1, %v235_v42 }
  0x1a   :  { %v148_v52 = vadd.f32 %v260_v21, %v100_v43  ;;  %v101_v53 = vmax.f32 %v85_v44, 0.0  ;;  %v102_v54 = vmax.f32 %v86_v45, 0.0  ;;  %v68_v55 = vmul.f32 %v363_v1, %v236_v46 }
  0x1b   :  { %v292_v56 = vpack.c.bf16 %v162_v49, %v161_v48  ;;  %v163_v57 = vmax.f32 %v147_v50, 0.0  ;;  %v87_v58 = vadd.f32 %v368_v4, %v67_v51  ;;  %v267_v59 = vunpack.c.l.bf16 %v322_v47 }
  0x1c   :  { %v164_v60 = vmax.f32 %v148_v52, 0.0  ;;  %v149_v61 = vadd.f32 %v263_v29, %v101_v53  ;;  %v150_v62 = vadd.f32 %v264_v38, %v102_v54  ;;  %v88_v63 = vadd.f32 %v368_v4, %v68_v55 }
  0x1d   :  { %326 = vst [vmem:[%s475_s4 + $0x20] sm:$0xff] %v292_v56   ;;  %v103_v0 = vmax.f32 %v87_v58, 0.0  ;;  %v268_v2 = vunpack.c.h.bf16 %v322_v47 }
  0x1e   :  { %v297_v3 = vpack.c.bf16 %v164_v60, %v163_v57  ;;  %v165_v5 = vmax.f32 %v149_v61, 0.0  ;;  %v166_v6 = vmax.f32 %v150_v62, 0.0  ;;  %v104_v1 = vmax.f32 %v88_v63, 0.0 }
  0x1f   :  { %v151_v7 = vadd.f32 %v267_v59, %v103_v0 }
  0x20   :  { %327 = vst [vmem:[%s475_s4 + $0x28] sm:$0xff] %v297_v3   ;;  %v302_v8 = vpack.c.bf16 %v166_v6, %v165_v5  ;;  %v152_v9 = vadd.f32 %v268_v2, %v104_v1 }
  0x21   :  { %v167_v10 = vmax.f32 %v151_v7, 0.0 }
  0x22   :  { %328 = vst [vmem:[%s475_s4 + $0x30] sm:$0xff] %v302_v8   ;;  %v168_v4 = vmax.f32 %v152_v9, 0.0 }
  0x24   :  { %v307_v11 = vpack.c.bf16 %v168_v4, %v167_v10 }
  0x26   :  { %329 = vst [vmem:[%s475_s4 + $0x38] sm:$0xff] %v307_v11  }

</bundles_post_ra>
